<compile_context>
chip_gen: v6e
topology: v6e:2x2x1
jax: 0.10.0
libtpu: 0.0.40
codegen_flags: <defaults>
</compile_context>

<pallas_src>
import functools
import math

import numpy as np
import jax
import jax.numpy as jnp
from jax.experimental import pallas as pl
from jax.experimental.pallas import tpu as pltpu

_VMEM = functools.partial(pl.BlockSpec, memory_space=pltpu.MemorySpace.VMEM)
_EPS = 1e-5


# ----------------------------------------------------------------------------
# Wrapper-side constant builders (static, folded by XLA under jit)
# ----------------------------------------------------------------------------
def _banded(w, w_in, w_out, stride, pad, dtype=jnp.bfloat16):
    """w: (KH, KW, Cin, Cout) -> (KH, w_in*Cin, w_out*Cout).

    B[i, wi*Cin+ci, ow*Cout+co] = w[i, kj, ci, co] where kj = wi - stride*ow + pad
    (zero outside the band / outside [0, W)).  The W-taps, W-stride AND the W
    zero-padding of the conv are all folded into the band, so the kernel only
    does contiguous row-window matmuls with K = w_in*Cin.
    """
    KH, KW, Cin, Cout = w.shape
    wi = np.arange(w_in)[None, :, None]
    ow = np.arange(w_out)[None, None, :]
    kj = np.arange(KW)[:, None, None]
    sel = (wi == stride * ow + kj - pad).astype(np.float32)      # (KW, w_in, w_out)
    b = jnp.einsum('jwo,ijcd->iwcod', jnp.asarray(sel), w.astype(jnp.float32))
    return b.reshape(KH, w_in * Cin, w_out * Cout).astype(dtype)


def _fold(w_len, c):
    """R[(w*c + ci), cj] = delta(ci, cj): folds per-lane sums into per-channel."""
    return jnp.asarray(np.tile(np.eye(c, dtype=np.float32), (w_len, 1)))


def _lane_tile(v, w_len):
    """(C,) channel vector -> (1, w_len*C) lane-layout broadcast (wrapper side)."""
    c = v.shape[-1]
    return jnp.tile(v.reshape(1, c), (1, w_len))


# ----------------------------------------------------------------------------
# Layout converters: NCHW <-> lane-dense (H*N, W*C) slab (use once per network)
# ----------------------------------------------------------------------------
def nchw_to_slab(x_nchw):
    n, c, h, w = x_nchw.shape
    return jnp.transpose(x_nchw, (2, 0, 3, 1)).reshape(h * n, w * c)


def slab_to_nchw(x2d, batch, channels):
    hn, wc = x2d.shape
    h, w = hn // batch, wc // channels
    return jnp.transpose(x2d.reshape(h, batch, w, channels), (1, 3, 0, 2))


# ----------------------------------------------------------------------------
# Fused BasicBlock forward on the (H*N, W*C) slab (one pallas_call per block)
# ----------------------------------------------------------------------------
@functools.partial(jax.jit, static_argnames=("batch", "stride"))
def basic_block_slab(params, x2d, *, batch, stride):
    w1 = params['w1']                                  # (3, 3, Cin, Cout)
    Cin, Cout = w1.shape[2], w1.shape[3]
    N = batch
    HN, WC = x2d.shape
    H, W = HN // N, WC // Cin
    equal = 'w_sc' not in params
    if equal:
        assert Cin == Cout and stride == 1, \
            "equalInOut residual (raw x) is only shape-valid with stride=1"

    Ho = (H - 1) // stride + 1
    Wo = (W - 1) // stride + 1

    # Constants: channel-fold / channel-broadcast matrices, banded bf16 conv
    # weights (W-pad folded in), and lane-tiled gamma/beta (data-independent,
    # so broadcast on the wrapper side instead of in-kernel M=1 matmuls).
    r1, r2 = _fold(W, Cin), _fold(Wo, Cout)
    r1t, r2t = r1.T, r2.T
    w1b = _banded(w1, W, Wo, stride, 1)                # 3x3, pad 1, stride s
    w2b = _banded(params['w2'], Wo, Wo, 1, 1)          # 3x3, pad 1, stride 1
    g1l = _lane_tile(params['g1'], W)
    b1l = _lane_tile(params['b1'], W)
    g2l = _lane_tile(params['g2'], Wo)
    b2l = _lane_tile(params['b2'], Wo)

    args = [x2d, r1, r1t, g1l, b1l, w1b, r2, r2t, g2l, b2l, w2b]
    if not equal:
        args.append(_banded(params['w_sc'], W, Wo, stride, 0)[0])   # 1x1, pad 0

    scratch = [pltpu.VMEM(((H + 2) * N, W * Cin), jnp.bfloat16),     # conv1 act
               pltpu.VMEM(((Ho + 2) * N, Wo * Cout), jnp.bfloat16)]  # conv2 act
    if stride > 1:
        scratch.append(pltpu.VMEM((Ho * N, Wo * Cout), jnp.float32))  # row gather

    def kernel(*refs):
        (x_ref, r1_ref, r1t_ref, g1l_ref, b1l_ref, w1b_ref,
         r2_ref, r2t_ref, g2l_ref, b2l_ref, w2b_ref) = refs[:11]
        idx = 11
        wsc_ref = None
        if not equal:
            wsc_ref = refs[idx]; idx += 1
        o_ref, ap_ref, ap2_ref = refs[idx], refs[idx + 1], refs[idx + 2]
        gsel_ref = refs[idx + 3] if stride > 1 else None

        f32 = jnp.float32

        def take_rows(v):
            # H-stride: gather row-blocks h = stride*oh via an f32 scratch
            # (sliced row-block copies instead of an f32 selection matmul).
            for oh in range(Ho):
                src = stride * oh * N
                gsel_ref[oh * N:(oh + 1) * N, :] = v[src:src + N, :]
            return gsel_ref[...]

        x = x_ref[...].astype(f32)                     # (H*N, W*Cin)

        # ---- BN1 (training-mode batch stats, two-pass variance) + ReLU ------
        inv_cnt1 = 1.0 / float(N * H * W)
        mean1_c = jnp.dot(jnp.sum(x, axis=0, keepdims=True), r1_ref[...],
                          preferred_element_type=f32) * inv_cnt1      # (1, Cin)
        d1 = x - jnp.dot(mean1_c, r1t_ref[...], preferred_element_type=f32)
        var1_c = jnp.dot(jnp.sum(d1 * d1, axis=0, keepdims=True), r1_ref[...],
                         preferred_element_type=f32) * inv_cnt1
        inv1_l = jnp.dot(jax.lax.rsqrt(var1_c + _EPS), r1t_ref[...],
                         preferred_element_type=f32)
        a = jnp.maximum(d1 * (g1l_ref[...] * inv1_l) + b1l_ref[...], 0.0)

        # ---- bf16 conv operand: zero only the H-padding border rows ---------
        zrow1 = jnp.zeros((N, W * Cin), ap_ref.dtype)
        ap_ref[0:N, :] = zrow1
        ap_ref[(H + 1) * N:(H + 2) * N, :] = zrow1
        ap_ref[N:(H + 1) * N, :] = a.astype(ap_ref.dtype)

        # ---- conv1: 3 banded matmuls, K = W*Cin (MXU-aligned) ---------------
        acc = jnp.dot(ap_ref[0:H * N, :], w1b_ref[0], preferred_element_type=f32)
        for i in (1, 2):
            acc = acc + jnp.dot(ap_ref[i * N:(i + H) * N, :], w1b_ref[i],
                                preferred_element_type=f32)
        if stride > 1:
            acc = take_rows(acc)                       # (Ho*N, Wo*Cout) f32

        # ---- BN2 (two-pass) + ReLU ------------------------------------------
        inv_cnt2 = 1.0 / float(N * Ho * Wo)
        mean2_c = jnp.dot(jnp.sum(acc, axis=0, keepdims=True), r2_ref[...],
                          preferred_element_type=f32) * inv_cnt2
        d2 = acc - jnp.dot(mean2_c, r2t_ref[...], preferred_element_type=f32)
        var2_c = jnp.dot(jnp.sum(d2 * d2, axis=0, keepdims=True), r2_ref[...],
                         preferred_element_type=f32) * inv_cnt2
        inv2_l = jnp.dot(jax.lax.rsqrt(var2_c + _EPS), r2t_ref[...],
                         preferred_element_type=f32)
        a2 = jnp.maximum(d2 * (g2l_ref[...] * inv2_l) + b2l_ref[...], 0.0)
        # TODO(synk): dropRate > 0 (F.dropout) not implemented; module default
        # dropRate=0.0 makes it a no-op.

        # ---- conv2 (3x3, stride 1) -------------------------------------------
        zrow2 = jnp.zeros((N, Wo * Cout), ap2_ref.dtype)
        ap2_ref[0:N, :] = zrow2
        ap2_ref[(Ho + 1) * N:(Ho + 2) * N, :] = zrow2
        ap2_ref[N:(Ho + 1) * N, :] = a2.astype(ap2_ref.dtype)
        acc2 = jnp.dot(ap2_ref[0:Ho * N, :], w2b_ref[0], preferred_element_type=f32)
        for i in (1, 2):
            acc2 = acc2 + jnp.dot(ap2_ref[i * N:(i + Ho) * N, :], w2b_ref[i],
                                  preferred_element_type=f32)

        # ---- residual add (x re-read here; shortcut matmul deferred here) ----
        if equal:
            res = x_ref[...].astype(f32)               # raw input x
        else:
            sc = jnp.dot(ap_ref[N:(H + 1) * N, :], wsc_ref[...],
                         preferred_element_type=f32)   # 1x1 shortcut on relu(bn1)
            res = take_rows(sc) if stride > 1 else sc
        o_ref[...] = (acc2 + res).astype(o_ref.dtype)

    flops = 2 * (
        3 * (H * N) * (W * Cin) * (Wo * Cout)
        + 3 * (Ho * N) * (Wo * Cout) * (Wo * Cout)
        + (0 if equal else (H * N) * (W * Cin) * (Wo * Cout))
    )
    bytes_accessed = sum(int(np.prod(a.shape)) * a.dtype.itemsize for a in args) \
        + (Ho * N) * (Wo * Cout) * x2d.dtype.itemsize

    out2d = pl.pallas_call(
        kernel,
        out_shape=jax.ShapeDtypeStruct((Ho * N, Wo * Cout), x2d.dtype),
        in_specs=[_VMEM() for _ in args],
        out_specs=_VMEM(),
        scratch_shapes=scratch,
        compiler_params=pltpu.CompilerParams(vmem_limit_bytes=64 * 1024 * 1024),
        cost_estimate=pl.CostEstimate(flops=flops,
                                      transcendentals=Cin + Cout,
                                      bytes_accessed=bytes_accessed),
    )(*args)
    return out2d


def basic_block_pallas(params, x_nchw, *, stride):
    """Module-equivalent NCHW wrapper (single block). For a network, chain
    blocks in the slab format and convert NCHW<->slab only at entry/exit."""
    n = x_nchw.shape[0]
    cout = params['w1'].shape[3]
    y2d = basic_block_slab(params, nchw_to_slab(x_nchw), batch=n, stride=stride)
    return slab_to_nchw(y2d, n, cout)


# ----------------------------------------------------------------------------
# Pure-JAX reference (training-mode BN), for a loose numerical sanity check
# ----------------------------------------------------------------------------
def _bn_train_ref(x, gamma, beta):
    mean = jnp.mean(x, axis=(0, 2, 3), keepdims=True)
    var = jnp.mean((x - mean) ** 2, axis=(0, 2, 3), keepdims=True)
    return (x - mean) * jax.lax.rsqrt(var + _EPS) * gamma.reshape(1, -1, 1, 1) \
        + beta.reshape(1, -1, 1, 1)


def _conv_ref(x, w, stride, padding):
    w_oihw = jnp.transpose(w, (3, 2, 0, 1))
    return jax.lax.conv_general_dilated(
        x, w_oihw, (stride, stride), [(padding, padding), (padding, padding)],
        dimension_numbers=('NCHW', 'OIHW', 'NCHW'))


def basic_block_reference(params, x, stride):
    equal = 'w_sc' not in params
    a = jax.nn.relu(_bn_train_ref(x, params['g1'], params['b1']))
    out = _conv_ref(a, params['w1'], stride, 1)
    out = jax.nn.relu(_bn_train_ref(out, params['g2'], params['b2']))
    out = _conv_ref(out, params['w2'], 1, 1)
    res = x if equal else _conv_ref(a, params['w_sc'], stride, 0)
    return out + res


# ----------------------------------------------------------------------------
# Parameter init (mirrors BasicBlock.__init__: BN gamma=1/beta=0, He conv init)
# ----------------------------------------------------------------------------
def init_basic_block_params(key, in_planes, out_planes):
    k1, k2, k3 = jax.random.split(key, 3)

    def conv_w(k, kh, kw, cin, cout):
        std = math.sqrt(2.0 / (kh * kw * cout))
        return std * jax.random.normal(k, (kh, kw, cin, cout), jnp.float32)

    p = {
        'g1': jnp.ones((in_planes,), jnp.float32),
        'b1': jnp.zeros((in_planes,), jnp.float32),
        'w1': conv_w(k1, 3, 3, in_planes, out_planes),
        'g2': jnp.ones((out_planes,), jnp.float32),
        'b2': jnp.zeros((out_planes,), jnp.float32),
        'w2': conv_w(k2, 3, 3, out_planes, out_planes),
    }
    if in_planes != out_planes:
        p['w_sc'] = conv_w(k3, 1, 1, in_planes, out_planes)
    return p


if __name__ == "__main__":
    key = jax.random.PRNGKey(0)
    kx, kp1, kp2 = jax.random.split(key, 3)
    N, C, H, W = 2, 16, 16, 16
    x = jax.random.normal(kx, (N, C, H, W), jnp.float32)

    # Block 1: equalInOut (16 -> 16, stride 1) — residual = raw input x.
    p1 = init_basic_block_params(kp1, 16, 16)
    # Block 2: channel change + downsample (16 -> 32, stride 2) — 1x1 shortcut.
    p2 = init_basic_block_params(kp2, 16, 32)

    # Chain blocks in the lane-dense slab format; NCHW <-> slab only at the
    # network boundary (one transpose in, one out).
    x_slab = nchw_to_slab(x)
    y1_slab = basic_block_slab(p1, x_slab, batch=N, stride=1)
    y2_slab = basic_block_slab(p2, y1_slab, batch=N, stride=2)
    y1 = slab_to_nchw(y1_slab, N, 16)
    y2 = slab_to_nchw(y2_slab, N, 32)
    jax.block_until_ready((y1, y2))
    assert y1.shape == (2, 16, 16, 16), y1.shape
    assert y2.shape == (2, 32, 8, 8), y2.shape

    # Loose sanity check vs. pure-JAX reference (bf16 MXU operands in kernel).
    r1 = basic_block_reference(p1, x, 1)
    r2 = basic_block_reference(p2, r1, 2)
    err1 = float(jnp.max(jnp.abs(y1 - r1)))
    err2 = float(jnp.max(jnp.abs(y2 - r2)))
    assert err1 < 0.5 and err2 < 0.5, (err1, err2)

    print("KERNEL_OK")
</pallas_src>

<mosaic_0001>
module attributes {stable_mosaic.version = 11 : i64} {
  func.func @kernel(%arg0: memref<32x256xf32, #tpu.memory_space<vmem>>, %arg1: memref<256x16xf32, #tpu.memory_space<vmem>>, %arg2: memref<16x256xf32, #tpu.memory_space<vmem>>, %arg3: memref<1x256xf32, #tpu.memory_space<vmem>>, %arg4: memref<1x256xf32, #tpu.memory_space<vmem>>, %arg5: memref<3x256x256xbf16, #tpu.memory_space<vmem>>, %arg6: memref<256x16xf32, #tpu.memory_space<vmem>>, %arg7: memref<16x256xf32, #tpu.memory_space<vmem>>, %arg8: memref<1x256xf32, #tpu.memory_space<vmem>>, %arg9: memref<1x256xf32, #tpu.memory_space<vmem>>, %arg10: memref<3x256x256xbf16, #tpu.memory_space<vmem>>, %arg11: memref<32x256xf32, #tpu.memory_space<vmem>>, %arg12: memref<36x256xbf16, #tpu.memory_space<vmem>>, %arg13: memref<36x256xbf16, #tpu.memory_space<vmem>>) attributes {dimension_semantics = [], scalar_prefetch = 0 : i64, scratch_operands = 2 : i64, tpu.core_type = #tpu.core_type<tc>} {
    %c0 = arith.constant 0 : index
    %c0_0 = arith.constant 0 : index
    %0 = vector.load %arg0[%c0, %c0_0] : memref<32x256xf32, #tpu.memory_space<vmem>>, vector<32x256xf32>
    %cst = arith.constant dense<0.000000e+00> : vector<256xf32>
    %1 = vector.multi_reduction <add>, %0, %cst [0] : vector<32x256xf32> to vector<256xf32>
    %2 = vector.shape_cast %1 : vector<256xf32> to vector<1x256xf32>
    %c0_1 = arith.constant 0 : index
    %c0_2 = arith.constant 0 : index
    %3 = vector.load %arg1[%c0_1, %c0_2] : memref<256x16xf32, #tpu.memory_space<vmem>>, vector<256x16xf32>
    %cst_3 = arith.constant dense<0.000000e+00> : vector<1x16xf32>
    %4 = tpu.matmul %2, %3, %cst_3 {dimension_numbers = #tpu.dot_dimension_numbers<[1], [0], [0], [1], [0, 0, 1, 1], [], []>} : vector<1x256xf32>, vector<256x16xf32>, vector<1x16xf32> -> vector<1x16xf32>
    %cst_4 = arith.constant 0.001953125 : f32
    %5 = vector.broadcast %cst_4 : f32 to vector<1x16xf32>
    %6 = arith.mulf %4, %5 : vector<1x16xf32>
    %c0_5 = arith.constant 0 : index
    %c0_6 = arith.constant 0 : index
    %7 = vector.load %arg2[%c0_5, %c0_6] : memref<16x256xf32, #tpu.memory_space<vmem>>, vector<16x256xf32>
    %cst_7 = arith.constant dense<0.000000e+00> : vector<1x256xf32>
    %8 = tpu.matmul %6, %7, %cst_7 {dimension_numbers = #tpu.dot_dimension_numbers<[1], [0], [0], [1], [0, 0, 1, 1], [], []>} : vector<1x16xf32>, vector<16x256xf32>, vector<1x256xf32> -> vector<1x256xf32>
    %9 = vector.broadcast %8 : vector<1x256xf32> to vector<32x256xf32>
    %10 = arith.subf %0, %9 : vector<32x256xf32>
    %11 = arith.mulf %10, %10 : vector<32x256xf32>
    %cst_8 = arith.constant dense<0.000000e+00> : vector<256xf32>
    %12 = vector.multi_reduction <add>, %11, %cst_8 [0] : vector<32x256xf32> to vector<256xf32>
    %13 = vector.shape_cast %12 : vector<256xf32> to vector<1x256xf32>
    %c0_9 = arith.constant 0 : index
    %c0_10 = arith.constant 0 : index
    %14 = vector.load %arg1[%c0_9, %c0_10] : memref<256x16xf32, #tpu.memory_space<vmem>>, vector<256x16xf32>
    %cst_11 = arith.constant dense<0.000000e+00> : vector<1x16xf32>
    %15 = tpu.matmul %13, %14, %cst_11 {dimension_numbers = #tpu.dot_dimension_numbers<[1], [0], [0], [1], [0, 0, 1, 1], [], []>} : vector<1x256xf32>, vector<256x16xf32>, vector<1x16xf32> -> vector<1x16xf32>
    %cst_12 = arith.constant 0.001953125 : f32
    %16 = vector.broadcast %cst_12 : f32 to vector<1x16xf32>
    %17 = arith.mulf %15, %16 : vector<1x16xf32>
    %cst_13 = arith.constant 9.99999974E-6 : f32
    %18 = vector.broadcast %cst_13 : f32 to vector<1x16xf32>
    %19 = arith.addf %17, %18 : vector<1x16xf32>
    %20 = math.rsqrt %19 : vector<1x16xf32>
    %c0_14 = arith.constant 0 : index
    %c0_15 = arith.constant 0 : index
    %21 = vector.load %arg2[%c0_14, %c0_15] : memref<16x256xf32, #tpu.memory_space<vmem>>, vector<16x256xf32>
    %cst_16 = arith.constant dense<0.000000e+00> : vector<1x256xf32>
    %22 = tpu.matmul %20, %21, %cst_16 {dimension_numbers = #tpu.dot_dimension_numbers<[1], [0], [0], [1], [0, 0, 1, 1], [], []>} : vector<1x16xf32>, vector<16x256xf32>, vector<1x256xf32> -> vector<1x256xf32>
    %c0_17 = arith.constant 0 : index
    %c0_18 = arith.constant 0 : index
    %23 = vector.load %arg3[%c0_17, %c0_18] : memref<1x256xf32, #tpu.memory_space<vmem>>, vector<1x256xf32>
    %24 = arith.mulf %23, %22 : vector<1x256xf32>
    %25 = vector.broadcast %24 : vector<1x256xf32> to vector<32x256xf32>
    %26 = arith.mulf %10, %25 : vector<32x256xf32>
    %c0_19 = arith.constant 0 : index
    %c0_20 = arith.constant 0 : index
    %27 = vector.load %arg4[%c0_19, %c0_20] : memref<1x256xf32, #tpu.memory_space<vmem>>, vector<1x256xf32>
    %28 = vector.broadcast %27 : vector<1x256xf32> to vector<32x256xf32>
    %29 = arith.addf %26, %28 : vector<32x256xf32>
    %cst_21 = arith.constant 0.000000e+00 : f32
    %30 = vector.broadcast %cst_21 : f32 to vector<32x256xf32>
    %31 = arith.maximumf %29, %30 : vector<32x256xf32>
    %cst_22 = arith.constant 0.000000e+00 : bf16
    %32 = vector.broadcast %cst_22 : bf16 to vector<2x256xbf16>
    %c0_23 = arith.constant 0 : index
    %c0_24 = arith.constant 0 : index
    %33 = vector.load %arg12[%c0_23, %c0_24] : memref<36x256xbf16, #tpu.memory_space<vmem>>, vector<2x256xbf16>
    tpu.vector_store %arg12[%c0_23, %c0_24], %32 {strides = array<i32>} : memref<36x256xbf16, #tpu.memory_space<vmem>>, vector<2x256xbf16>,
    %c34 = arith.constant 34 : index
    %c0_25 = arith.constant 0 : index
    %34 = vector.load %arg12[%c34, %c0_25] : memref<36x256xbf16, #tpu.memory_space<vmem>>, vector<2x256xbf16>
    tpu.vector_store %arg12[%c34, %c0_25], %32 {strides = array<i32>} : memref<36x256xbf16, #tpu.memory_space<vmem>>, vector<2x256xbf16>,
    %35 = arith.truncf %31 : vector<32x256xf32> to vector<32x256xbf16>
    %c2 = arith.constant 2 : index
    %c0_26 = arith.constant 0 : index
    %36 = vector.load %arg12[%c2, %c0_26] : memref<36x256xbf16, #tpu.memory_space<vmem>>, vector<32x256xbf16>
    tpu.vector_store %arg12[%c2, %c0_26], %35 {strides = array<i32>} : memref<36x256xbf16, #tpu.memory_space<vmem>>, vector<32x256xbf16>,
    %c0_27 = arith.constant 0 : index
    %c0_28 = arith.constant 0 : index
    %37 = vector.load %arg12[%c0_27, %c0_28] : memref<36x256xbf16, #tpu.memory_space<vmem>>, vector<32x256xbf16>
    %c0_29 = arith.constant 0 : index
    %c0_30 = arith.constant 0 : index
    %c0_31 = arith.constant 0 : index
    %38 = vector.load %arg5[%c0_29, %c0_30, %c0_31] : memref<3x256x256xbf16, #tpu.memory_space<vmem>>, vector<1x256x256xbf16>
    %39 = vector.shape_cast %38 : vector<1x256x256xbf16> to vector<256x256xbf16>
    %cst_32 = arith.constant dense<0.000000e+00> : vector<32x256xf32>
    %40 = tpu.matmul %37, %39, %cst_32 {dimension_numbers = #tpu.dot_dimension_numbers<[1], [0], [0], [1], [0, 0, 1, 1], [], []>} : vector<32x256xbf16>, vector<256x256xbf16>, vector<32x256xf32> -> vector<32x256xf32>
    %c2_33 = arith.constant 2 : index
    %c0_34 = arith.constant 0 : index
    %41 = vector.load %arg12[%c2_33, %c0_34] : memref<36x256xbf16, #tpu.memory_space<vmem>>, vector<32x256xbf16>
    %c1 = arith.constant 1 : index
    %c0_35 = arith.constant 0 : index
    %c0_36 = arith.constant 0 : index
    %42 = vector.load %arg5[%c1, %c0_35, %c0_36] : memref<3x256x256xbf16, #tpu.memory_space<vmem>>, vector<1x256x256xbf16>
    %43 = vector.shape_cast %42 : vector<1x256x256xbf16> to vector<256x256xbf16>
    %cst_37 = arith.constant dense<0.000000e+00> : vector<32x256xf32>
    %44 = tpu.matmul %41, %43, %cst_37 {dimension_numbers = #tpu.dot_dimension_numbers<[1], [0], [0], [1], [0, 0, 1, 1], [], []>} : vector<32x256xbf16>, vector<256x256xbf16>, vector<32x256xf32> -> vector<32x256xf32>
    %45 = arith.addf %40, %44 : vector<32x256xf32>
    %c4 = arith.constant 4 : index
    %c0_38 = arith.constant 0 : index
    %46 = vector.load %arg12[%c4, %c0_38] : memref<36x256xbf16, #tpu.memory_space<vmem>>, vector<32x256xbf16>
    %c2_39 = arith.constant 2 : index
    %c0_40 = arith.constant 0 : index
    %c0_41 = arith.constant 0 : index
    %47 = vector.load %arg5[%c2_39, %c0_40, %c0_41] : memref<3x256x256xbf16, #tpu.memory_space<vmem>>, vector<1x256x256xbf16>
    %48 = vector.shape_cast %47 : vector<1x256x256xbf16> to vector<256x256xbf16>
    %cst_42 = arith.constant dense<0.000000e+00> : vector<32x256xf32>
    %49 = tpu.matmul %46, %48, %cst_42 {dimension_numbers = #tpu.dot_dimension_numbers<[1], [0], [0], [1], [0, 0, 1, 1], [], []>} : vector<32x256xbf16>, vector<256x256xbf16>, vector<32x256xf32> -> vector<32x256xf32>
    %50 = arith.addf %45, %49 : vector<32x256xf32>
    %cst_43 = arith.constant dense<0.000000e+00> : vector<256xf32>
    %51 = vector.multi_reduction <add>, %50, %cst_43 [0] : vector<32x256xf32> to vector<256xf32>
    %52 = vector.shape_cast %51 : vector<256xf32> to vector<1x256xf32>
    %c0_44 = arith.constant 0 : index
    %c0_45 = arith.constant 0 : index
    %53 = vector.load %arg6[%c0_44, %c0_45] : memref<256x16xf32, #tpu.memory_space<vmem>>, vector<256x16xf32>
    %cst_46 = arith.constant dense<0.000000e+00> : vector<1x16xf32>
    %54 = tpu.matmul %52, %53, %cst_46 {dimension_numbers = #tpu.dot_dimension_numbers<[1], [0], [0], [1], [0, 0, 1, 1], [], []>} : vector<1x256xf32>, vector<256x16xf32>, vector<1x16xf32> -> vector<1x16xf32>
    %cst_47 = arith.constant 0.001953125 : f32
    %55 = vector.broadcast %cst_47 : f32 to vector<1x16xf32>
    %56 = arith.mulf %54, %55 : vector<1x16xf32>
    %c0_48 = arith.constant 0 : index
    %c0_49 = arith.constant 0 : index
    %57 = vector.load %arg7[%c0_48, %c0_49] : memref<16x256xf32, #tpu.memory_space<vmem>>, vector<16x256xf32>
    %cst_50 = arith.constant dense<0.000000e+00> : vector<1x256xf32>
    %58 = tpu.matmul %56, %57, %cst_50 {dimension_numbers = #tpu.dot_dimension_numbers<[1], [0], [0], [1], [0, 0, 1, 1], [], []>} : vector<1x16xf32>, vector<16x256xf32>, vector<1x256xf32> -> vector<1x256xf32>
    %59 = vector.broadcast %58 : vector<1x256xf32> to vector<32x256xf32>
    %60 = arith.subf %50, %59 : vector<32x256xf32>
    %61 = arith.mulf %60, %60 : vector<32x256xf32>
    %cst_51 = arith.constant dense<0.000000e+00> : vector<256xf32>
    %62 = vector.multi_reduction <add>, %61, %cst_51 [0] : vector<32x256xf32> to vector<256xf32>
    %63 = vector.shape_cast %62 : vector<256xf32> to vector<1x256xf32>
    %c0_52 = arith.constant 0 : index
    %c0_53 = arith.constant 0 : index
    %64 = vector.load %arg6[%c0_52, %c0_53] : memref<256x16xf32, #tpu.memory_space<vmem>>, vector<256x16xf32>
    %cst_54 = arith.constant dense<0.000000e+00> : vector<1x16xf32>
    %65 = tpu.matmul %63, %64, %cst_54 {dimension_numbers = #tpu.dot_dimension_numbers<[1], [0], [0], [1], [0, 0, 1, 1], [], []>} : vector<1x256xf32>, vector<256x16xf32>, vector<1x16xf32> -> vector<1x16xf32>
    %cst_55 = arith.constant 0.001953125 : f32
    %66 = vector.broadcast %cst_55 : f32 to vector<1x16xf32>
    %67 = arith.mulf %65, %66 : vector<1x16xf32>
    %cst_56 = arith.constant 9.99999974E-6 : f32
    %68 = vector.broadcast %cst_56 : f32 to vector<1x16xf32>
    %69 = arith.addf %67, %68 : vector<1x16xf32>
    %70 = math.rsqrt %69 : vector<1x16xf32>
    %c0_57 = arith.constant 0 : index
    %c0_58 = arith.constant 0 : index
    %71 = vector.load %arg7[%c0_57, %c0_58] : memref<16x256xf32, #tpu.memory_space<vmem>>, vector<16x256xf32>
    %cst_59 = arith.constant dense<0.000000e+00> : vector<1x256xf32>
    %72 = tpu.matmul %70, %71, %cst_59 {dimension_numbers = #tpu.dot_dimension_numbers<[1], [0], [0], [1], [0, 0, 1, 1], [], []>} : vector<1x16xf32>, vector<16x256xf32>, vector<1x256xf32> -> vector<1x256xf32>
    %c0_60 = arith.constant 0 : index
    %c0_61 = arith.constant 0 : index
    %73 = vector.load %arg8[%c0_60, %c0_61] : memref<1x256xf32, #tpu.memory_space<vmem>>, vector<1x256xf32>
    %74 = arith.mulf %73, %72 : vector<1x256xf32>
    %75 = vector.broadcast %74 : vector<1x256xf32> to vector<32x256xf32>
    %76 = arith.mulf %60, %75 : vector<32x256xf32>
    %c0_62 = arith.constant 0 : index
    %c0_63 = arith.constant 0 : index
    %77 = vector.load %arg9[%c0_62, %c0_63] : memref<1x256xf32, #tpu.memory_space<vmem>>, vector<1x256xf32>
    %78 = vector.broadcast %77 : vector<1x256xf32> to vector<32x256xf32>
    %79 = arith.addf %76, %78 : vector<32x256xf32>
    %cst_64 = arith.constant 0.000000e+00 : f32
    %80 = vector.broadcast %cst_64 : f32 to vector<32x256xf32>
    %81 = arith.maximumf %79, %80 : vector<32x256xf32>
    %cst_65 = arith.constant 0.000000e+00 : bf16
    %82 = vector.broadcast %cst_65 : bf16 to vector<2x256xbf16>
    %c0_66 = arith.constant 0 : index
    %c0_67 = arith.constant 0 : index
    %83 = vector.load %arg13[%c0_66, %c0_67] : memref<36x256xbf16, #tpu.memory_space<vmem>>, vector<2x256xbf16>
    tpu.vector_store %arg13[%c0_66, %c0_67], %82 {strides = array<i32>} : memref<36x256xbf16, #tpu.memory_space<vmem>>, vector<2x256xbf16>,
    %c34_68 = arith.constant 34 : index
    %c0_69 = arith.constant 0 : index
    %84 = vector.load %arg13[%c34_68, %c0_69] : memref<36x256xbf16, #tpu.memory_space<vmem>>, vector<2x256xbf16>
    tpu.vector_store %arg13[%c34_68, %c0_69], %82 {strides = array<i32>} : memref<36x256xbf16, #tpu.memory_space<vmem>>, vector<2x256xbf16>,
    %85 = arith.truncf %81 : vector<32x256xf32> to vector<32x256xbf16>
    %c2_70 = arith.constant 2 : index
    %c0_71 = arith.constant 0 : index
    %86 = vector.load %arg13[%c2_70, %c0_71] : memref<36x256xbf16, #tpu.memory_space<vmem>>, vector<32x256xbf16>
    tpu.vector_store %arg13[%c2_70, %c0_71], %85 {strides = array<i32>} : memref<36x256xbf16, #tpu.memory_space<vmem>>, vector<32x256xbf16>,
    %c0_72 = arith.constant 0 : index
    %c0_73 = arith.constant 0 : index
    %87 = vector.load %arg13[%c0_72, %c0_73] : memref<36x256xbf16, #tpu.memory_space<vmem>>, vector<32x256xbf16>
    %c0_74 = arith.constant 0 : index
    %c0_75 = arith.constant 0 : index
    %c0_76 = arith.constant 0 : index
    %88 = vector.load %arg10[%c0_74, %c0_75, %c0_76] : memref<3x256x256xbf16, #tpu.memory_space<vmem>>, vector<1x256x256xbf16>
    %89 = vector.shape_cast %88 : vector<1x256x256xbf16> to vector<256x256xbf16>
    %cst_77 = arith.constant dense<0.000000e+00> : vector<32x256xf32>
    %90 = tpu.matmul %87, %89, %cst_77 {dimension_numbers = #tpu.dot_dimension_numbers<[1], [0], [0], [1], [0, 0, 1, 1], [], []>} : vector<32x256xbf16>, vector<256x256xbf16>, vector<32x256xf32> -> vector<32x256xf32>
    %c2_78 = arith.constant 2 : index
    %c0_79 = arith.constant 0 : index
    %91 = vector.load %arg13[%c2_78, %c0_79] : memref<36x256xbf16, #tpu.memory_space<vmem>>, vector<32x256xbf16>
    %c1_80 = arith.constant 1 : index
    %c0_81 = arith.constant 0 : index
    %c0_82 = arith.constant 0 : index
    %92 = vector.load %arg10[%c1_80, %c0_81, %c0_82] : memref<3x256x256xbf16, #tpu.memory_space<vmem>>, vector<1x256x256xbf16>
    %93 = vector.shape_cast %92 : vector<1x256x256xbf16> to vector<256x256xbf16>
    %cst_83 = arith.constant dense<0.000000e+00> : vector<32x256xf32>
    %94 = tpu.matmul %91, %93, %cst_83 {dimension_numbers = #tpu.dot_dimension_numbers<[1], [0], [0], [1], [0, 0, 1, 1], [], []>} : vector<32x256xbf16>, vector<256x256xbf16>, vector<32x256xf32> -> vector<32x256xf32>
    %95 = arith.addf %90, %94 : vector<32x256xf32>
    %c4_84 = arith.constant 4 : index
    %c0_85 = arith.constant 0 : index
    %96 = vector.load %arg13[%c4_84, %c0_85] : memref<36x256xbf16, #tpu.memory_space<vmem>>, vector<32x256xbf16>
    %c2_86 = arith.constant 2 : index
    %c0_87 = arith.constant 0 : index
    %c0_88 = arith.constant 0 : index
    %97 = vector.load %arg10[%c2_86, %c0_87, %c0_88] : memref<3x256x256xbf16, #tpu.memory_space<vmem>>, vector<1x256x256xbf16>
    %98 = vector.shape_cast %97 : vector<1x256x256xbf16> to vector<256x256xbf16>
    %cst_89 = arith.constant dense<0.000000e+00> : vector<32x256xf32>
    %99 = tpu.matmul %96, %98, %cst_89 {dimension_numbers = #tpu.dot_dimension_numbers<[1], [0], [0], [1], [0, 0, 1, 1], [], []>} : vector<32x256xbf16>, vector<256x256xbf16>, vector<32x256xf32> -> vector<32x256xf32>
    %100 = arith.addf %95, %99 : vector<32x256xf32>
    %c0_90 = arith.constant 0 : index
    %c0_91 = arith.constant 0 : index
    %101 = vector.load %arg0[%c0_90, %c0_91] : memref<32x256xf32, #tpu.memory_space<vmem>>, vector<32x256xf32>
    %102 = arith.addf %100, %101 : vector<32x256xf32>
    %c0_92 = arith.constant 0 : index
    %c0_93 = arith.constant 0 : index
    %103 = vector.load %arg11[%c0_92, %c0_93] : memref<32x256xf32, #tpu.memory_space<vmem>>, vector<32x256xf32>
    tpu.vector_store %arg11[%c0_92, %c0_93], %102 {strides = array<i32>} : memref<32x256xf32, #tpu.memory_space<vmem>>, vector<32x256xf32>,
    return
  }
}

</mosaic_0001>

<bundles_post_ra>
// kernel: basic_block_slab.1
= control target key start
LH: loop header
LB: loop body
LE: loop exit
PB: predicated region body
PF: predicated region fallthrough
CT: control target
= control target key end

     0   :  { %s4962_s0 = inlined_call_operand.vmem [shape: f32[32,256], index: 0, kind: input, shape index: {}]   ;;  %s4963_s1 = inlined_call_operand.vmem [shape: f32[256,16], index: 1, kind: input, shape index: {}, may-alias: {1,6}]   ;;  %s4964_s2 = inlined_call_operand.vmem [shape: f32[16,256], index: 2, kind: input, shape index: {}, may-alias: {2,7}]   ;;  %s4965_s3 = inlined_call_operand.vmem [shape: f32[1,256], index: 3, kind: input, shape index: {}]   ;;  %s4966_s4 = inlined_call_operand.vmem [shape: f32[1,256], index: 4, kind: input, shape index: {}]   ;;  %s4967_s5 = inlined_call_operand.vmem [shape: bf16[3,256,256], index: 5, kind: input, shape index: {}]   ;;  %s4968_s6 = inlined_call_operand.vmem [shape: f32[256,16], index: 6, kind: input, shape index: {}, may-alias: {1,6}]   ;;  %s4969_s7 = inlined_call_operand.vmem [shape: f32[16,256], index: 7, kind: input, shape index: {}, may-alias: {2,7}]   ;;  %s4970_s8 = inlined_call_operand.vmem [shape: f32[1,256], index: 8, kind: input, shape index: {}]   ;;  %s4971_s9 = inlined_call_operand.vmem [shape: f32[1,256], index: 9, kind: input, shape index: {}]   ;;  %s4972_s10 = inlined_call_operand.vmem [shape: bf16[3,256,256], index: 10, kind: input, shape index: {}]   ;;  %s4973_s11 = inlined_call_operand.hbm [shape: f32[32,256], index: 11, kind: output, shape index: {}]  }
   0x1   :  { %v3633_v0 = vld [vmem:[%s4963_s1 + $0xf8] sm:$0xff]  ;;  %v3643_v2 = vld [vmem:[%s4963_s1 + $0xf0] sm:$0xff]  ;;  %v3655_v4 = vld [vmem:[%s4963_s1 + $0xe8] sm:$0xff] }
   0x2   :  { %v3638_v1 = vld [vmem:[%s4963_s1 + $0x78] sm:$0xff]  ;;  %3096 = vmatprep.subr.mxu1 %v3633_v0  ;;  %v3649_v3 = vld [vmem:[%s4963_s1 + $0x70] sm:$0xff]  ;;  %v3661_v5 = vld [vmem:[%s4963_s1 + $0x68] sm:$0xff] }
   0x3   :  { %3097 = vmatpush3.msra.mxu1 %v3638_v1  ;;  %v3667_v6 = vld [vmem:[%s4963_s1 + $0xe0] sm:$0xff]  ;;  %v3679_v8 = vld [vmem:[%s4963_s1 + $0xd8] sm:$0xff]  ;;  %v3691_v10 = vld [vmem:[%s4963_s1 + $0xd0] sm:$0xff] }
   0x4   :  { %3098 = vmatprep.subr.mxu1 %v3643_v2  ;;  %v3673_v7 = vld [vmem:[%s4963_s1 + $0x60] sm:$0xff]  ;;  %v3685_v9 = vld [vmem:[%s4963_s1 + $0x58] sm:$0xff]  ;;  %v3697_v11 = vld [vmem:[%s4963_s1 + $0x50] sm:$0xff] }
   0x5   :  { %3099 = vmatpush3.msra.mxu1 %v3649_v3  ;;  %v3702_v12 = vld [vmem:[%s4963_s1 + $0xc8] sm:$0xff]  ;;  %v3713_v14 = vld [vmem:[%s4963_s1 + $0xc0] sm:$0xff]  ;;  %v3729_v17 = vld [vmem:[%s4962_s0 + $0x18] sm:$0xff] }
   0x6   :  { %3100 = vmatprep.subr.mxu1 %v3655_v4  ;;  %v3708_v13 = vld [vmem:[%s4963_s1 + $0x48] sm:$0xff]  ;;  %v3724_v16 = vld [vmem:[%s4963_s1 + $0x40] sm:$0xff]  ;;  %v3739_v19 = vld [vmem:[%s4962_s0 + $0x38] sm:$0xff] }
   0x7   :  { %3101 = vmatpush3.msra.mxu1 %v3661_v5  ;;  %v3718_v15 = vld [vmem:[%s4962_s0 + $0x8] sm:$0xff]  ;;  %v3745_v20 = vld [vmem:[%s4963_s1 + $0xb8] sm:$0xff]  ;;  %v3752_v22 = vld [vmem:[%s4962_s0] sm:$0xff] }
   0x8   :  { %3102 = vmatprep.subr.mxu1 %v3667_v6  ;;  %v3734_v18 = vld [vmem:[%s4962_s0 + $0x28] sm:$0xff]  ;;  %v57_v21 = vadd.f32 %v3729_v17, %v3718_v15  ;;  %v3757_v23 = vld [vmem:[%s4962_s0 + $0x10] sm:$0xff]  ;;  %v3762_v24 = vld [vmem:[%s4962_s0 + $0x20] sm:$0xff] }
   0x9   :  { %3103 = vmatpush3.msra.mxu1 %v3673_v7  ;;  %v3768_v25 = vld [vmem:[%s4963_s1 + $0x38] sm:$0xff]  ;;  %v3773_v26 = vld [vmem:[%s4962_s0 + $0x30] sm:$0xff]  ;;  %v48_v27 = vadd.f32 %v3757_v23, %v3752_v22  ;;  %v3795_v32 = vld [vmem:[%s4963_s1 + $0xa8] sm:$0xff] }
   0xa   :  { %3104 = vmatprep.subr.mxu1 %v3679_v8  ;;  %v3781_v28 = vld [vmem:[%s4963_s1 + $0xb0] sm:$0xff]  ;;  %v58_v29 = vadd.f32 %v57_v21, %v3734_v18  ;;  %v71_v34 = vld [vmem:[%s4963_s1 + $0x28] sm:$0xff]  ;;  %v86_v36 = vld [vmem:[%s4963_s1 + $0xa0] sm:$0xff] }
   0xb   :  { %3105 = vmatpush3.msra.mxu1 %v3685_v9  ;;  %v3788_v30 = vld [vmem:[%s4963_s1 + $0x30] sm:$0xff]  ;;  %v49_v31 = vadd.f32 %v48_v27, %v3762_v24  ;;  %v70_v38 = vld [vmem:[%s4963_s1 + $0x20] sm:$0xff]  ;;  %v85_v40 = vld [vmem:[%s4963_s1 + $0x98] sm:$0xff] }
   0xc   :  { %3106 = vmatprep.subr.mxu1 %v3691_v10  ;;  %v59_v33 = vadd.f32 %v58_v29, %v3739_v19  ;;  %v69_v42 = vld [vmem:[%s4963_s1 + $0x18] sm:$0xff]  ;;  %v84_v44 = vld [vmem:[%s4963_s1 + $0x90] sm:$0xff]  ;;  %v83_v48 = vld [vmem:[%s4963_s1 + $0x88] sm:$0xff] }
   0xd   :  { %3107 = vmatpush3.msra.mxu1 %v3697_v11  ;;  %v50_v35 = vadd.f32 %v49_v31, %v3773_v26  ;;  %v68_v46 = vld [vmem:[%s4963_s1 + $0x10] sm:$0xff]  ;;  %v67_v50 = vld [vmem:[%s4963_s1 + $0x8] sm:$0xff]  ;;  %v82_v52 = vld [vmem:[%s4963_s1 + $0x80] sm:$0xff] }
   0xe   :  { %3108 = vmatprep.subr.mxu1 %v3702_v12  ;;  %v60_v37 = vrot.slane %v59_v33, 4  ;;  %v66_v54 = vld [vmem:[%s4963_s1] sm:$0xff] }
   0xf   :  { %3109 = vmatpush3.msra.mxu1 %v3708_v13  ;;  %v51_v39 = vrot.slane %v50_v35, 4 }
  0x10   :  { %3110 = vmatprep.subr.mxu1 %v3713_v14  ;;  %v61_v41 = vadd.f32 %v60_v37, %v59_v33 }
  0x11   :  { %3111 = vmatpush3.msra.mxu1 %v3724_v16  ;;  %v52_v43 = vadd.f32 %v51_v39, %v50_v35 }
  0x12   :  { %3112 = vmatprep.subr.mxu1 %v3745_v20  ;;  %v62_v45 = vrot.slane %v61_v41, 2 }
  0x13   :  { %3113 = vmatpush3.msra.mxu1 %v3768_v25  ;;  %v53_v47 = vrot.slane %v52_v43, 2 }
  0x14   :  { %3114 = vmatprep.subr.mxu1 %v3781_v28  ;;  %v63_v49 = vadd.f32 %v62_v45, %v61_v41 }
  0x15   :  { %3115 = vmatpush3.msra.mxu1 %v3788_v30  ;;  %v54_v51 = vadd.f32 %v53_v47, %v52_v43 }
  0x16   :  { %3116 = vmatprep.subr.mxu1 %v3795_v32  ;;  %v64_v53 = vrot.slane %v63_v49, 1 }
  0x17   :  { %3117 = vmatpush3.msra.mxu1 %v71_v34  ;;  %v55_v55 = vrot.slane %v54_v51, 1 }
  0x18   :  { %3118 = vmatprep.subr.mxu1 %v86_v36  ;;  %v65_v56 = vadd.f32 %v64_v53, %v63_v49 }
  0x19   :  { %3119 = vmatpush3.msra.mxu1 %v70_v38  ;;  %v56_v57 = vadd.f32 %v55_v55, %v54_v51 }
  0x1a   :  { %3120 = vmatprep.subr.mxu1 %v85_v40  ;;  %162 = vmatprep.mubr.f32.mxu1 %v65_v56 }
  0x1b   :  { %3121 = vmatpush3.msra.mxu1 %v69_v42 }
  0x1c   :  { %3122 = vmatprep.subr.mxu1 %v84_v44 }
  0x1d   :  { %3123 = vmatpush3.msra.mxu1 %v68_v46 }
  0x1e   :  { %3124 = vmatprep.subr.mxu1 %v83_v48 }
  0x1f   :  { %3125 = vmatpush3.msra.mxu1 %v67_v50 }
  0x20   :  { %3126 = vmatprep.subr.mxu1 %v82_v52 }
  0x21   :  { %3127 = vmatpush3.msra.mxu1 %v66_v54 }
  0x22   :  { %163 = vmatmul.mubr.f32.vlgmr.msra.gmra.mxu1 %v56_v57  ;;  %3131 = vmatprep.subr.mxu1 %v3633_v0 }
  0x23   :  { %3132 = vmatpush3.msra.mxu1 %v3638_v1 }
  0x24   :  { %3133 = vmatprep.subr.mxu1 %v3643_v2 }
  0x25   :  { %3134 = vmatpush3.msra.mxu1 %v3649_v3 }
  0x26   :  { %3135 = vmatprep.subr.mxu1 %v3655_v4 }
  0x27   :  { %3136 = vmatpush3.msra.mxu1 %v3661_v5 }
  0x28   :  { %3137 = vmatprep.subr.mxu1 %v3667_v6 }
  0x29   :  { %3138 = vmatpush3.msra.mxu1 %v3673_v7 }
  0x2a   :  { %3139 = vmatprep.subr.mxu1 %v3679_v8 }
  0x2b   :  { %3140 = vmatpush3.msra.mxu1 %v3685_v9 }
  0x2c   :  { %3141 = vmatprep.subr.mxu1 %v3691_v10 }
  0x2d   :  { %3142 = vmatpush3.msra.mxu1 %v3697_v11 }
  0x2e   :  { %3143 = vmatprep.subr.mxu1 %v3702_v12 }
  0x2f   :  { %3144 = vmatpush3.msra.mxu1 %v3708_v13 }
  0x30   :  { %3145 = vmatprep.subr.mxu1 %v3713_v14 }
  0x31   :  { %3146 = vmatpush3.msra.mxu1 %v3724_v16 }
  0x32   :  { %3147 = vmatprep.subr.mxu1 %v3745_v20 }
  0x33   :  { %3148 = vmatpush3.msra.mxu1 %v3768_v25 }
  0x34   :  { %3149 = vmatprep.subr.mxu1 %v3781_v28 }
  0x35   :  { %3150 = vmatpush3.msra.mxu1 %v3788_v30 }
  0x36   :  { %3151 = vmatprep.subr.mxu1 %v3795_v32 }
  0x37   :  { %3152 = vmatpush3.msra.mxu1 %v71_v34 }
  0x38   :  { %3153 = vmatprep.subr.mxu1 %v86_v36 }
  0x39   :  { %3154 = vmatpush3.msra.mxu1 %v70_v38 }
  0x3a   :  { %3155 = vmatprep.subr.mxu1 %v85_v40 }
  0x3b   :  { %3156 = vmatpush3.msra.mxu1 %v69_v42 }
  0x3c   :  { %3157 = vmatprep.subr.mxu1 %v84_v44 }
  0x3d   :  { %3158 = vmatpush3.msra.mxu1 %v68_v46 }
  0x3e   :  { %3159 = vmatprep.subr.mxu1 %v83_v48 }
  0x3f   :  { %3160 = vmatpush3.msra.mxu1 %v67_v50 }
  0x40   :  { %3161 = vmatprep.subr.mxu1 %v82_v52 }
  0x41   :  { %3162 = vmatpush3.msra.mxu1 %v66_v54 }
  0x42   :  { %16 = vsyncpa [#allocation5], 0  ;;  %v172_v58 = vld [vmem:[%s4964_s2 + $0x18] sm:$0xff]  ;;  %v171_v59 = vld [vmem:[%s4964_s2 + $0x10] sm:$0xff]  ;;  %v4974_v62 = vmov 0.0   ;;  %vm173_vm0 = vcmask 130048   ;;  %v248_v3 = vlaneseq }
  0x43   :  { %205 = vmatprep.subr.mxu0 %v172_v58  ;;  %v170_v60 = vld [vmem:[%s4964_s2 + $0x8] sm:$0xff]  ;;  %v169_v61 = vld [vmem:[%s4964_s2] sm:$0xff]  ;;  %241 = vmatprep.mubr.f32.mxu0 %v4974_v62  ;;  %v3242_v44 = vld [vmem:[%s4967_s5 + $0x70] ss:$8 sps:$4 sm:$0xff]   ;;  %vm526_vm1 = vcmask 1040384   ;;  %vm527_vm2 = vcmask 1044484  }
  0x44   :  { %206 = vmatpush1.msra.mxu0 %v171_v59  ;;  %v3873_v4 = vshrl.u32 %v248_v3, 7  ;;  %v3244_v45 = vld [vmem:[%s4967_s5 + $0x74] ss:$8 sps:$4 sm:$0xff]   ;;  %v3250_v47 = vld [vmem:[%s4967_s5 + $0x64] ss:$8 sps:$4 sm:$0xff]   ;;  %vm4142_vm3 = vmor %vm526_vm1, %vm527_vm2  ;;  %vm642_vm4 = vcmask 1046528  }
  0x45   :  { %207 = vmatprep.subr.mxu0 %v170_v60  ;;  %v3247_v46 = vld [vmem:[%s4967_s5 + $0x174] ss:$8 sps:$4 sm:$0xff]   ;;  %1039 = vmatprep.subr.bf16.mxu1 %v3244_v45  ;;  %v3248_v48 = vld [vmem:[%s4967_s5 + $0x60] ss:$8 sps:$4 sm:$0xff]   ;;  %v3254_v50 = vld [vmem:[%s4967_s5 + $0x50] ss:$8 sps:$4 sm:$0xff]  }
  0x46   :  { %208 = vmatpush1.msra.mxu0 %v169_v61  ;;  %v3876_v5 = vsub.s32 0, %v3873_v4  ;;  %v3256_v49 = vld [vmem:[%s4967_s5 + $0x54] ss:$8 sps:$4 sm:$0xff]   ;;  %v3262_v51 = vld [vmem:[%s4967_s5 + $0x44] ss:$8 sps:$4 sm:$0xff]   ;;  %vm1137_vm5 = vcmask 1045504  }
  0x47   :  { %394 = vmatprep.subr.mxu0 %v172_v58  ;;  %v3260_v52 = vld [vmem:[%s4967_s5 + $0x40] ss:$8 sps:$4 sm:$0xff]   ;;  %v3268_v53 = vld [vmem:[%s4967_s5 + $0x34] ss:$8 sps:$4 sm:$0xff]   ;;  %v3266_v54 = vld [vmem:[%s4967_s5 + $0x30] ss:$8 sps:$4 sm:$0xff]  }
  0x48   :  { %4985 = vst [vmem:[#allocation7_spill] sm:$0xff] %v3876_v5  ;;  %v3274_v55 = vld [vmem:[%s4967_s5 + $0x24] ss:$8 sps:$4 sm:$0xff]   ;;  %v3272_v56 = vld [vmem:[%s4967_s5 + $0x20] ss:$8 sps:$4 sm:$0xff]   ;;  %s3567_s25 = smov [#allocation4]  }
  0x49   :  { %v3280_v57 = vld [vmem:[%s4967_s5 + $0x14] ss:$8 sps:$4 sm:$0xff]   ;;  %v3278_v58 = vld [vmem:[%s4967_s5 + $0x10] ss:$8 sps:$4 sm:$0xff]   ;;  %s2721_s26 = sshll.u32 %s3567_s25, 4  ;;  %s2722_s26 = int_to_ptr.vmem [resolvable:$true] %s2721_s26 }
  0x4a   :  { %v3316_v45 = vld [vmem:[%s4967_s5 + $0xb4] ss:$8 sps:$4 sm:$0xff]   ;;  %s3542_s27 = scalar_lea.vmem %s2722_s26, 1024  ;;  %p3547_p1 = scmp.lt.s32.totalorder %s2722_s26, %s2722_s26 }
  0x4b   :  { %p3543_p0 = scmp.ne.s32.totalorder %s2722_s26, %s3542_s27  ;;  %p3548_p2 = scmp.lt.s32.totalorder %s3542_s27, %s3542_s27 }
  0x4d   :  { %p3549_p3 = por %p3548_p2, %p3547_p1 }
  0x4f   :  { %p3550_p4 = pnand %p3549_p3, %p3543_p0 }
  0xe2   :  { %v3128_v63 = vpop.f32.mrf.mxu1 }
  0xe4   :  { %v3129_v0 = vpop.f32.mrf.mxu1 }
  0xe5   :  { %v3130_v1 = vadd.f32 %v3129_v0, %v3128_v63 }
  0xe7   :  { %v168_v2 = vmul.f32 0.001953125, %v3130_v1  ;;  %v3245_v1 = vld [vmem:[%s4967_s5 + $0x170] ss:$8 sps:$4 sm:$0xff]  }
  0xe9   :  { %2732 = vmatmul.mubr.msk.f32.vlgmr.msra.gmra.mxu0 %vm173_vm0, %v168_v2  ;;  %v3253_v2 = vld [vmem:[%s4967_s5 + $0x164] ss:$8 sps:$4 sm:$0xff]  }
  0xea   :  { %395 = vmatpush1.msra.mxu0 %v171_v59  ;;  %430 = vmatprep.mubr.f32.mxu0 %v4974_v62 }
  0xeb   :  { %396 = vmatprep.subr.mxu0 %v170_v60 }
  0xec   :  { %397 = vmatpush1.msra.mxu0 %v169_v61 }
  0xed   :  { %817 = vmatprep.subr.bf16.mxu0 %v3247_v46  ;;  %v3314_v46 = vld [vmem:[%s4967_s5 + $0xb0] ss:$8 sps:$4 sm:$0xff]  }
 0x1a9   :  { %v243_v6 = vpop.f32.mrf.mxu0 }
 0x1aa   :  { %v251_v7 = vrot.slane %v243_v6, %v3876_v5  ;;  %v3251_v6 = vld [vmem:[%s4967_s5 + $0x160] ss:$8 sps:$4 sm:$0xff]  }
 0x1ab   :  { %v245_v8 = vpop.f32.mrf.mxu0 }
 0x1ac   :  { %v3880_v9 = vsub.f32 %v3752_v22, %v251_v7  ;;  %v3883_v10 = vsub.f32 %v3757_v23, %v251_v7  ;;  %v3886_v11 = vsub.f32 %v3762_v24, %v251_v7  ;;  %v255_v12 = vrot.slane %v245_v8, %v3876_v5  ;;  %v3257_v8 = vld [vmem:[%s4967_s5 + $0x150] ss:$8 sps:$4 sm:$0xff]  }
 0x1ad   :  { %v3890_v13 = vsub.f32 %v3773_v26, %v251_v7  ;;  %v3259_v7 = vld [vmem:[%s4967_s5 + $0x154] ss:$8 sps:$4 sm:$0xff]  }
 0x1ae   :  { %v264_v14 = vmul.f32 %v3880_v9, %v3880_v9  ;;  %v266_v16 = vmul.f32 %v3883_v10, %v3883_v10  ;;  %v3897_v20 = vsub.f32 %v3718_v15, %v255_v12  ;;  %v3900_v21 = vsub.f32 %v3729_v17, %v255_v12 }
 0x1af   :  { %v3903_v22 = vsub.f32 %v3734_v18, %v255_v12  ;;  %v268_v23 = vmul.f32 %v3886_v11, %v3886_v11  ;;  %v3908_v25 = vsub.f32 %v3739_v19, %v255_v12  ;;  %v270_v17 = vmul.f32 %v3890_v13, %v3890_v13  ;;  %v3265_v12 = vld [vmem:[%s4967_s5 + $0x144] ss:$8 sps:$4 sm:$0xff]  }
 0x1b0   :  { %v272_v24 = vadd.f32 %v266_v16, %v264_v14  ;;  %v265_v26 = vmul.f32 %v3897_v20, %v3897_v20  ;;  %v267_v15 = vmul.f32 %v3900_v21, %v3900_v21  ;;  %v3263_v14 = vld [vmem:[%s4967_s5 + $0x140] ss:$8 sps:$4 sm:$0xff]   ;;  %v3271_v16 = vld [vmem:[%s4967_s5 + $0x134] ss:$8 sps:$4 sm:$0xff]  }
 0x1b1   :  { %v269_v18 = vmul.f32 %v3903_v22, %v3903_v22  ;;  %v271_v30 = vmul.f32 %v3908_v25, %v3908_v25 }
 0x1b2   :  { %v273_v27 = vadd.f32 %v272_v24, %v268_v23  ;;  %v281_v28 = vadd.f32 %v267_v15, %v265_v26  ;;  %v3269_v23 = vld [vmem:[%s4967_s5 + $0x130] ss:$8 sps:$4 sm:$0xff]   ;;  %v3277_v24 = vld [vmem:[%s4967_s5 + $0x124] ss:$8 sps:$4 sm:$0xff]   ;;  %v3275_v26 = vld [vmem:[%s4967_s5 + $0x120] ss:$8 sps:$4 sm:$0xff]  }
 0x1b3   :  { %v3283_v15 = vld [vmem:[%s4967_s5 + $0x114] ss:$8 sps:$4 sm:$0xff]  }
 0x1b4   :  { %v274_v29 = vadd.f32 %v273_v27, %v270_v17  ;;  %v282_v19 = vadd.f32 %v281_v28, %v269_v18  ;;  %v3281_v17 = vld [vmem:[%s4967_s5 + $0x110] ss:$8 sps:$4 sm:$0xff]   ;;  %v3286_v27 = vld [vmem:[%s4967_s5 + $0x4] ss:$8 sps:$4 sm:$0xff]   ;;  %v3284_v18 = vld [vmem:[%s4967_s5] ss:$8 sps:$4 sm:$0xff]  }
 0x1b5   :  { %v3289_v28 = vld [vmem:[%s4967_s5 + $0x104] ss:$8 sps:$4 sm:$0xff]  }
 0x1b6   :  { %v275_v31 = vrot.slane %v274_v29, 4  ;;  %v283_v32 = vadd.f32 %v282_v19, %v271_v30  ;;  %v3292_v30 = vld [vmem:[%s4967_s5 + $0xf4] ss:$8 sps:$4 sm:$0xff]   ;;  %v3290_v19 = vld [vmem:[%s4967_s5 + $0xf0] ss:$8 sps:$4 sm:$0xff]  }
 0x1b8   :  { %v276_v33 = vadd.f32 %v275_v31, %v274_v29  ;;  %v284_v34 = vrot.slane %v283_v32, 4  ;;  %v3287_v29 = vld [vmem:[%s4967_s5 + $0x100] ss:$8 sps:$4 sm:$0xff]   ;;  %v3295_v31 = vld [vmem:[%s4967_s5 + $0x1f4] ss:$8 sps:$4 sm:$0xff]  }
 0x1ba   :  { %v277_v35 = vrot.slane %v276_v33, 2  ;;  %v285_v36 = vadd.f32 %v284_v34, %v283_v32  ;;  %v3293_v32 = vld [vmem:[%s4967_s5 + $0x1f0] ss:$8 sps:$4 sm:$0xff]   ;;  %v3296_v34 = vld [vmem:[%s4967_s5 + $0xe0] ss:$8 sps:$4 sm:$0xff]  }
 0x1bc   :  { %v278_v37 = vadd.f32 %v277_v35, %v276_v33  ;;  %v286_v38 = vrot.slane %v285_v36, 2  ;;  %v3298_v33 = vld [vmem:[%s4967_s5 + $0xe4] ss:$8 sps:$4 sm:$0xff]  }
 0x1bd   :  { %v3301_v35 = vld [vmem:[%s4967_s5 + $0x1e4] ss:$8 sps:$4 sm:$0xff]  }
 0x1be   :  { %v287_v39 = vadd.f32 %v286_v38, %v285_v36  ;;  %v279_v40 = vrot.slane %v278_v37, 1  ;;  %v3299_v36 = vld [vmem:[%s4967_s5 + $0x1e0] ss:$8 sps:$4 sm:$0xff]   ;;  %v3302_v38 = vld [vmem:[%s4967_s5 + $0xd0] ss:$8 sps:$4 sm:$0xff]  }
 0x1c0   :  { %v288_v41 = vrot.slane %v287_v39, 1  ;;  %v280_v43 = vadd.f32 %v279_v40, %v278_v37  ;;  %v3304_v37 = vld [vmem:[%s4967_s5 + $0xd4] ss:$8 sps:$4 sm:$0xff]   ;;  %v3305_v40 = vld [vmem:[%s4967_s5 + $0x1d0] ss:$8 sps:$4 sm:$0xff]  }
 0x1c2   :  { %v289_v42 = vadd.f32 %v288_v41, %v287_v39  ;;  %v3307_v39 = vld [vmem:[%s4967_s5 + $0x1d4] ss:$8 sps:$4 sm:$0xff]   ;;  %v3310_v41 = vld [vmem:[%s4967_s5 + $0xc4] ss:$8 sps:$4 sm:$0xff]  }
 0x1c4   :  { %354 = vmatprep.mubr.f32.mxu1 %v289_v42  ;;  %v3308_v42 = vld [vmem:[%s4967_s5 + $0xc0] ss:$8 sps:$4 sm:$0xff]  }
 0x1c5   :  { %355 = vmatmul.mubr.f32.vlgmr.msra.gmra.mxu1 %v280_v43  ;;  %v3313_v43 = vld [vmem:[%s4967_s5 + $0x1c4] ss:$8 sps:$4 sm:$0xff]  }
 0x1c6   :  { %1040 = vmatpush1.bf16.msra.mxu1 %v3242_v44  ;;  %v3311_v44 = vld [vmem:[%s4967_s5 + $0x1c0] ss:$8 sps:$4 sm:$0xff]  }
 0x1c7   :  { %1041 = vmatprep.subr.bf16.mxu1 %v3250_v47  ;;  %v3319_v47 = vld [vmem:[%s4967_s5 + $0x1b4] ss:$8 sps:$4 sm:$0xff]  }
 0x1ca   :  { %1042 = vmatpush1.bf16.msra.mxu1 %v3248_v48  ;;  %v3317_v48 = vld [vmem:[%s4967_s5 + $0x1b0] ss:$8 sps:$4 sm:$0xff]  }
 0x1cb   :  { %1043 = vmatprep.subr.bf16.mxu1 %v3256_v49  ;;  %v3322_v49 = vld [vmem:[%s4967_s5 + $0xa4] ss:$8 sps:$4 sm:$0xff]  }
 0x1ce   :  { %1044 = vmatpush1.bf16.msra.mxu1 %v3254_v50  ;;  %v3320_v50 = vld [vmem:[%s4967_s5 + $0xa0] ss:$8 sps:$4 sm:$0xff]  }
 0x1cf   :  { %1045 = vmatprep.subr.bf16.mxu1 %v3262_v51  ;;  %v3325_v51 = vld [vmem:[%s4967_s5 + $0x1a4] ss:$8 sps:$4 sm:$0xff]  }
 0x1d2   :  { %1046 = vmatpush1.bf16.msra.mxu1 %v3260_v52  ;;  %v3323_v52 = vld [vmem:[%s4967_s5 + $0x1a0] ss:$8 sps:$4 sm:$0xff]  }
 0x1d3   :  { %1047 = vmatprep.subr.bf16.mxu1 %v3268_v53  ;;  %v3565_v53 = vmov 0  }
 0x1d4   :  { %504 = vst [vmem:[#allocation2 + $0x20] sm:$0x11] %v3565_v53  ;;  %505 = vst [vmem:[#allocation2] sm:$0x22] %v3565_v53 }
 0x1d5   :  { %1828 = vst [vmem:[#allocation3] sm:$0x11] %v3565_v53  ;;  %1829 = vst [vmem:[#allocation3 + $0x20] sm:$0x22] %v3565_v53 }
 0x1d6   :  { %1048 = vmatpush1.bf16.msra.mxu1 %v3266_v54  ;;  %v3328_v54 = vld [vmem:[%s4967_s5 + $0x94] ss:$8 sps:$4 sm:$0xff]  }
 0x1d7   :  { %1049 = vmatprep.subr.bf16.mxu1 %v3274_v55  ;;  %v3326_v55 = vld [vmem:[%s4967_s5 + $0x90] ss:$8 sps:$4 sm:$0xff]  }
 0x1da   :  { %1050 = vmatpush1.bf16.msra.mxu1 %v3272_v56  ;;  %v3329_v56 = vld [vmem:[%s4967_s5 + $0x190] ss:$8 sps:$4 sm:$0xff]  }
 0x1db   :  { %1051 = vmatprep.subr.bf16.mxu1 %v3280_v57  ;;  %v3331_v57 = vld [vmem:[%s4967_s5 + $0x194] ss:$8 sps:$4 sm:$0xff]  }
 0x1de   :  { %1052 = vmatpush1.bf16.msra.mxu1 %v3278_v58  ;;  %v3332_v58 = vld [vmem:[%s4967_s5 + $0x80] ss:$8 sps:$4 sm:$0xff]  }
 0x1df   :  { %1053 = vmatprep.subr.bf16.mxu1 %v3286_v27 }
 0x1e2   :  { %1054 = vmatpush1.bf16.msra.mxu1 %v3284_v18 }
 0x1e3   :  { %1055 = vmatprep.subr.bf16.mxu1 %v3292_v30 }
 0x1e6   :  { %1056 = vmatpush2.bf16.msra.mxu1 %v3290_v19 }
 0x1e7   :  { %1057 = vmatprep.subr.bf16.mxu1 %v3298_v33 }
 0x1ea   :  { %1058 = vmatpush2.bf16.msra.mxu1 %v3296_v34 }
 0x1eb   :  { %1059 = vmatprep.subr.bf16.mxu1 %v3304_v37 }
 0x1ee   :  { %1060 = vmatpush2.bf16.msra.mxu1 %v3302_v38 }
 0x1ef   :  { %1061 = vmatprep.subr.bf16.mxu1 %v3310_v41 }
 0x1f2   :  { %1062 = vmatpush2.bf16.msra.mxu1 %v3308_v42 }
 0x1f3   :  { %1063 = vmatprep.subr.bf16.mxu1 %v3316_v45 }
 0x1f6   :  { %1064 = vmatpush2.bf16.msra.mxu1 %v3314_v46 }
 0x1f7   :  { %1065 = vmatprep.subr.bf16.mxu1 %v3322_v49 }
 0x1fa   :  { %1066 = vmatpush2.bf16.msra.mxu1 %v3320_v50 }
 0x1fb   :  { %1067 = vmatprep.subr.bf16.mxu1 %v3328_v54 }
 0x1fe   :  { %1068 = vmatpush2.bf16.msra.mxu1 %v3326_v55 }
 0x285   :  { %v3163_v59 = vpop.f32.mrf.mxu1 }
 0x287   :  { %v3164_v60 = vpop.f32.mrf.mxu1 }
 0x288   :  { %v3165_v61 = vadd.f32 %v3164_v60, %v3163_v59  ;;  %v3334_v59 = vld [vmem:[%s4967_s5 + $0x84] ss:$8 sps:$4 sm:$0xff]  }
 0x289   :  { %v3337_v60 = vld [vmem:[%s4967_s5 + $0x184] ss:$8 sps:$4 sm:$0xff]   ;;  %1069 = vmatprep.subr.bf16.mxu1 %v3334_v59 }
 0x28a   :  { %v360_v63 = vmul.f32 0.001953125, %v3165_v61  ;;  %v3335_v61 = vld [vmem:[%s4967_s5 + $0x180] ss:$8 sps:$4 sm:$0xff]   ;;  %1070 = vmatpush2.bf16.msra.mxu1 %v3332_v58 }
 0x28c   :  { %v361_v0 = vadd.f32 1e-05, %v360_v63  ;;  %v3340_v63 = vld [vmem:[%s4967_s5 + $0x274] ss:$8 sps:$4 sm:$0xff]  }
 0x28e   :  { %3538 = vrsqrt.f32 %v361_v0  ;;  %v3566_v0 = vmov 1966171168  }
 0x29b   :  { %v3539_v3 = vpop.eup %3538 }
 0x29c   :  { %2733 = vmatmul.mubr.msk.f32.vlgmr.msra.gmra.mxu0 %vm173_vm0, %v3539_v3 }
 0x29d   :  { %818 = vmatpush1.bf16.msra.mxu0 %v3245_v1  ;;  %v442_v1 = vunpack.c.l.s4 %v3566_v0 }
 0x29e   :  { %819 = vmatprep.subr.bf16.mxu0 %v3253_v2 }
 0x29f   :  { %v443_v2 = vunpack.c.0.s8 %v442_v1 }
 0x2a1   :  { %820 = vmatpush1.bf16.msra.mxu0 %v3251_v6  ;;  %v4117_v6 = vsub.s32 %v443_v2, %v3873_v4 }
 0x2a2   :  { %821 = vmatprep.subr.bf16.mxu0 %v3259_v7 }
 0x2a3   :  { %4986 = vst [vmem:[#allocation8_spill] sm:$0xff] %v4117_v6 }
 0x2a5   :  { %822 = vmatpush1.bf16.msra.mxu0 %v3257_v8 }
 0x2a6   :  { %823 = vmatprep.subr.bf16.mxu0 %v3265_v12 }
 0x2a9   :  { %824 = vmatpush1.bf16.msra.mxu0 %v3263_v14  ;;  %v437_v14 = vld [vmem:[%s4965_s3] sm:$0x3] }
 0x2aa   :  { %825 = vmatprep.subr.bf16.mxu0 %v3271_v16 }
 0x2ad   :  { %826 = vmatpush1.bf16.msra.mxu0 %v3269_v23  ;;  %v4125_v23 = vsub.s32 1, %v3873_v4 }
 0x2ae   :  { %827 = vmatprep.subr.bf16.mxu0 %v3277_v24  ;;  %v476_v24 = vld [vmem:[%s4966_s4] sm:$0x3] }
 0x2af   :  { %4987 = vst [vmem:[#allocation9_spill] sm:$0xff] %v4125_v23  ;;  %v481_v27 = vrot.slane %v476_v24, %v3876_v5  ;;  %v485_v18 = vrot.slane %v476_v24, %v4125_v23 }
 0x2b1   :  { %828 = vmatpush1.bf16.msra.mxu0 %v3275_v26 }
 0x2b2   :  { %829 = vmatprep.subr.bf16.mxu0 %v3283_v15 }
 0x2b5   :  { %830 = vmatpush1.bf16.msra.mxu0 %v3281_v17 }
 0x2b6   :  { %831 = vmatprep.subr.bf16.mxu0 %v3289_v28 }
 0x2b9   :  { %832 = vmatpush1.bf16.msra.mxu0 %v3287_v29 }
 0x2ba   :  { %833 = vmatprep.subr.bf16.mxu0 %v3295_v31 }
 0x2bd   :  { %834 = vmatpush2.bf16.msra.mxu0 %v3293_v32 }
 0x2be   :  { %835 = vmatprep.subr.bf16.mxu0 %v3301_v35 }
 0x2c1   :  { %836 = vmatpush2.bf16.msra.mxu0 %v3299_v36 }
 0x2c2   :  { %837 = vmatprep.subr.bf16.mxu0 %v3307_v39 }
 0x2c5   :  { %838 = vmatpush2.bf16.msra.mxu0 %v3305_v40 }
 0x2c6   :  { %839 = vmatprep.subr.bf16.mxu0 %v3313_v43 }
 0x2c9   :  { %840 = vmatpush2.bf16.msra.mxu0 %v3311_v44 }
 0x2ca   :  { %841 = vmatprep.subr.bf16.mxu0 %v3319_v47 }
 0x2cd   :  { %842 = vmatpush2.bf16.msra.mxu0 %v3317_v48  ;;  %v4988_v48 = vmov 0 }
 0x2ce   :  { %843 = vmatprep.subr.bf16.mxu0 %v3325_v51  ;;  %v4989_v48 = vsel %vm4142_vm3, 4294967295, %v4988_v48 }
 0x2cf   :  { %4990 = vst [vmem:[#allocation10_spill] sm:$0xff] %v4989_v48 }
 0x2d1   :  { %844 = vmatpush2.bf16.msra.mxu0 %v3323_v52 }
 0x2d2   :  { %845 = vmatprep.subr.bf16.mxu0 %v3331_v57 }
 0x2d5   :  { %846 = vmatpush2.bf16.msra.mxu0 %v3329_v56 }
 0x2d6   :  { %847 = vmatprep.subr.bf16.mxu0 %v3337_v60 }
 0x2d9   :  { %848 = vmatpush2.bf16.msra.mxu0 %v3335_v61 }
 0x2da   :  { %1312 = vmatprep.subr.bf16.mxu0 %v3340_v63 }
 0x35c   :  { %v432_v3 = vpop.f32.mrf.mxu0 }
 0x35e   :  { %v434_v7 = vpop.f32.mrf.mxu0 }
 0x35f   :  { %v440_v8 = vcombine.low %v432_v3, %v434_v7 }
 0x361   :  { %v447_v12 = vrot.slane %v440_v8, %v4117_v6 }
 0x363   :  { %v454_v16 = vrot.slane %v447_v12, %v4117_v6 }
 0x365   :  { %v456_v26 = vmul.f32 %v454_v16, %v437_v14 }
 0x367   :  { %v461_v15 = vrot.slane %v456_v26, %v3876_v5  ;;  %v465_v17 = vrot.slane %v456_v26, %v4125_v23  ;;  %v3338_v26 = vld [vmem:[%s4967_s5 + $0x270] ss:$8 sps:$4 sm:$0xff]  }
 0x369   :  { %v468_v28 = vmul.f32 %v461_v15, %v3880_v9  ;;  %v469_v29 = vmul.f32 %v465_v17, %v3897_v20  ;;  %v470_v4 = vmul.f32 %v461_v15, %v3883_v10  ;;  %v471_v30 = vmul.f32 %v465_v17, %v3900_v21 }
 0x36a   :  { %v472_v19 = vmul.f32 %v461_v15, %v3886_v11  ;;  %v473_v31 = vmul.f32 %v465_v17, %v3903_v22  ;;  %v474_v32 = vmul.f32 %v461_v15, %v3890_v13  ;;  %v475_v33 = vmul.f32 %v465_v17, %v3908_v25 }
 0x36b   :  { %v488_v34 = vadd.f32 %v481_v27, %v468_v28  ;;  %v489_v35 = vadd.f32 %v485_v18, %v469_v29  ;;  %v490_v36 = vadd.f32 %v481_v27, %v470_v4  ;;  %v491_v37 = vadd.f32 %v485_v18, %v471_v30  ;;  %v3344_v29 = vld [vmem:[%s4967_s5 + $0x264] ss:$8 sps:$4 sm:$0xff]  }
 0x36c   :  { %v492_v38 = vadd.f32 %v481_v27, %v472_v19  ;;  %v493_v9 = vadd.f32 %v485_v18, %v473_v31  ;;  %v494_v39 = vadd.f32 %v481_v27, %v474_v32  ;;  %v495_v20 = vadd.f32 %v485_v18, %v475_v33  ;;  %v3342_v33 = vld [vmem:[%s4967_s5 + $0x260] ss:$8 sps:$4 sm:$0xff]  }
 0x36d   :  { %v496_v40 = vmax.f32 %v488_v34, 0.0  ;;  %v497_v10 = vmax.f32 %v489_v35, 0.0  ;;  %v498_v41 = vmax.f32 %v490_v36, 0.0  ;;  %v499_v21 = vmax.f32 %v491_v37, 0.0  ;;  %v3347_v34 = vld [vmem:[%s4967_s5 + $0x254] ss:$8 sps:$4 sm:$0xff]  }
 0x36e   :  { %v500_v42 = vmax.f32 %v492_v38, 0.0  ;;  %v501_v11 = vmax.f32 %v493_v9, 0.0  ;;  %v502_v43 = vmax.f32 %v494_v39, 0.0  ;;  %v503_v22 = vmax.f32 %v495_v20, 0.0  ;;  %v3345_v37 = vld [vmem:[%s4967_s5 + $0x250] ss:$8 sps:$4 sm:$0xff]  }
 0x36f   :  { %v3088_v44 = vpack.c.bf16 %v497_v10, %v496_v40  ;;  %v3089_v13 = vpack.c.bf16 %v499_v21, %v498_v41  ;;  %v3351_v9 = vld [vmem:[%s4967_s5 + $0x244] ss:$8 sps:$4 sm:$0xff]   ;;  %v3349_v40 = vld [vmem:[%s4967_s5 + $0x240] ss:$8 sps:$4 sm:$0xff]   ;;  %v3354_v10 = vld [vmem:[%s4967_s5 + $0x234] ss:$8 sps:$4 sm:$0xff]  }
 0x370   :  { %v3090_v25 = vpack.c.bf16 %v501_v11, %v500_v42  ;;  %v3091_v45 = vpack.c.bf16 %v503_v22, %v502_v43  ;;  %v3352_v41 = vld [vmem:[%s4967_s5 + $0x230] ss:$8 sps:$4 sm:$0xff]   ;;  %v3357_v21 = vld [vmem:[%s4967_s5 + $0x224] ss:$8 sps:$4 sm:$0xff]   ;;  %v3355_v42 = vld [vmem:[%s4967_s5 + $0x220] ss:$8 sps:$4 sm:$0xff]  }
 0x371   :  { %v529_v46 = vrot.slane %v3088_v44, 7  ;;  %v531_v47 = vrot.slane %v3089_v13, 7  ;;  %v3360_v11 = vld [vmem:[%s4967_s5 + $0x214] ss:$8 sps:$4 sm:$0xff]   ;;  %v3358_v43 = vld [vmem:[%s4967_s5 + $0x210] ss:$8 sps:$4 sm:$0xff]  }
 0x372   :  { %v534_v49 = vrot.slane %v3090_v25, 7  ;;  %v537_v50 = vrot.slane %v3091_v45, 7  ;;  %v3363_v22 = vld [vmem:[%s4967_s5 + $0x204] ss:$8 sps:$4 sm:$0xff]   ;;  %v3361_v44 = vld [vmem:[%s4967_s5 + $0x200] ss:$8 sps:$4 sm:$0xff]  }
 0x373   :  { %v530_v51 = vrot.slane %v529_v46, 4  ;;  %v533_v52 = vrot.slane %v531_v47, 4  ;;  %545 = vst [vmem:[#allocation2 + $0x20] sm:$0xee] %v529_v46  ;;  %v3366_v13 = vld [vmem:[%s4967_s5 + $0x2f4] ss:$8 sps:$4 sm:$0xff]  }
 0x374   :  { %v536_v53 = vrot.slane %v534_v49, 4  ;;  %v539_v54 = vrot.slane %v537_v50, 4  ;;  %v3364_v25 = vld [vmem:[%s4967_s5 + $0x2f0] ss:$8 sps:$4 sm:$0xff]   ;;  %v3369_v45 = vld [vmem:[%s4967_s5 + $0x2e4] ss:$8 sps:$4 sm:$0xff]  }
 0x375   :  { %v532_v55 = vsel %vm4142_vm3, %v530_v51, %v531_v47  ;;  %v535_v56 = vsel %vm4142_vm3, %v533_v52, %v534_v49  ;;  %v3367_v46 = vld [vmem:[%s4967_s5 + $0x2e0] ss:$8 sps:$4 sm:$0xff]   ;;  %v3372_v47 = vld [vmem:[%s4967_s5 + $0x2d4] ss:$8 sps:$4 sm:$0xff]   ;;  %v3370_v49 = vld [vmem:[%s4967_s5 + $0x2d0] ss:$8 sps:$4 sm:$0xff]  }
 0x376   :  { %v538_v57 = vsel %vm4142_vm3, %v536_v53, %v537_v50  ;;  %549 = vst [vmem:[#allocation2] sm:$0x11] %v539_v54  ;;  %v3375_v50 = vld [vmem:[%s4967_s5 + $0x2c4] ss:$8 sps:$4 sm:$0xff]   ;;  %v3373_v51 = vld [vmem:[%s4967_s5 + $0x2c0] ss:$8 sps:$4 sm:$0xff]  }
 0x377   :  { %v4152_v58 = vcombine.low %v535_v56, %v538_v57  ;;  %v4154_v59 = vcombine.high %v535_v56, %v538_v57  ;;  %v3378_v52 = vld [vmem:[%s4967_s5 + $0x2b4] ss:$8 sps:$4 sm:$0xff]   ;;  %v3376_v53 = vld [vmem:[%s4967_s5 + $0x2b0] ss:$8 sps:$4 sm:$0xff]   ;;  %v3381_v54 = vld [vmem:[%s4967_s5 + $0x2a4] ss:$8 sps:$4 sm:$0xff]  }
 0x378   :  { %v3384_v56 = vld [vmem:[%s4967_s5 + $0x294] ss:$8 sps:$4 sm:$0xff]   ;;  %v3382_v57 = vld [vmem:[%s4967_s5 + $0x290] ss:$8 sps:$4 sm:$0xff]  }
 0x379   :  { %v647_v12 = vrot.slane %v4154_v59, 1  ;;  %v644_v16 = vrot.slane %v4152_v58, 1  ;;  %v1139_v27 = vrot.slane %v4152_v58, 2  ;;  %v1142_v38 = vrot.slane %v4154_v59, 2 }
 0x37a   :  { %v550_v60 = vld [vmem:[#allocation2 + $0x20] sm:$0xff] }
 0x37b   :  { %v586_v61 = vld [vmem:[#allocation2 + $0x20] sm:$0xee]  ;;  %v2808_v0 = vcombine.low %v550_v60, %v532_v55  ;;  %v2809_v1 = vcombine.high %v550_v60, %v532_v55 }
 0x37c   :  { %v1092_v63 = vld [vmem:[#allocation2 + $0x20] sm:$0xcc]  ;;  %v2771_v2 = vcombine.high %v586_v61, %v532_v55  ;;  %v2770_v3 = vcombine.low %v586_v61, %v532_v55 }
 0x37d   :  { %v2874_v7 = vcombine.low %v1092_v63, %v532_v55  ;;  %1071 = vmatprep.mubr.bf16.mxu1 %v2809_v1  ;;  %v587_v24 = vld [vmem:[#allocation2] sm:$0x11]  ;;  %v2875_v31 = vcombine.high %v1092_v63, %v532_v55 }
 0x37e   :  { %v646_v8 = vrot.slane %v2771_v2, 1  ;;  %v643_v14 = vrot.slane %v2770_v3, 1  ;;  %1072 = vmatmul.mubr.bf16.vlgmr.msra.gmra.mxu1 %v2808_v0  ;;  %v2775_v15 = vcombine.high %v587_v24, %v587_v24  ;;  %v2774_v30 = vcombine.low %v587_v24, %v587_v24  ;;  %v3379_v55 = vld [vmem:[%s4967_s5 + $0x2a0] ss:$8 sps:$4 sm:$0xff]   ;;  %v3387_v61 = vld [vmem:[%s4967_s5 + $0x284] ss:$8 sps:$4 sm:$0xff]  }
 0x37f   :  { %v1138_v17 = vrot.slane %v2874_v7, 2  ;;  %1081 = vmatprep.mubr.bf16.mxu1 %v4154_v59  ;;  %v1141_v36 = vrot.slane %v2875_v31, 2  ;;  %v1093_v60 = vld [vmem:[#allocation2] sm:$0x33]  ;;  %v4283_v59 = vld [vmem:[%s4968_s6 + $0x78] sm:$0xff]  ;;  %v4307_v24 = vld [vmem:[%s4968_s6 + $0x68] sm:$0xff] }
 0x380   :  { %v648_v18 = vsel %vm642_vm4, %v646_v8, %v647_v12  ;;  %v645_v28 = vsel %vm642_vm4, %v643_v14, %v644_v16  ;;  %v651_v4 = vrot.slane %v2775_v15, 1  ;;  %v649_v35 = vrot.slane %v2774_v30, 1  ;;  %v3385_v0 = vld [vmem:[%s4967_s5 + $0x280] ss:$8 sps:$4 sm:$0xff]   ;;  %v4295_v14 = vld [vmem:[%s4968_s6 + $0x70] sm:$0xff]  ;;  %v4373_v31 = vld [vmem:[%s4968_s6 + $0xb8] sm:$0xff] }
 0x381   :  { %849 = vmatprep.mubr.bf16.mxu0 %v648_v18  ;;  %v4171_v19 = vsel %vm1137_vm5, %v1138_v17, %v1139_v27  ;;  %v1143_v20 = vsel %vm1137_vm5, %v1141_v36, %v1142_v38  ;;  %v2877_v63 = vcombine.high %v1093_v60, %v1093_v60  ;;  %v2876_v2 = vcombine.low %v1093_v60, %v1093_v60  ;;  %v4319_v15 = vld [vmem:[%s4968_s6 + $0x60] sm:$0xff]  ;;  %v4325_v17 = vld [vmem:[%s4968_s6 + $0xd8] sm:$0xff]  ;;  %v4337_v18 = vld [vmem:[%s4968_s6 + $0xd0] sm:$0xff] }
 0x382   :  { %850 = vmatmul.mubr.bf16.vlgmr.msra.gmra.mxu0 %v645_v28  ;;  %v652_v32 = vsel %vm642_vm4, %v647_v12, %v651_v4  ;;  %v650_v39 = vsel %vm642_vm4, %v644_v16, %v649_v35  ;;  %v4277_v12 = vld [vmem:[%s4968_s6 + $0xf8] sm:$0xff]  ;;  %v4301_v16 = vld [vmem:[%s4968_s6 + $0xe8] sm:$0xff]  ;;  %v4343_v28 = vld [vmem:[%s4968_s6 + $0x50] sm:$0xff] }
 0x383   :  { %1313 = vmatpush1.bf16.msra.mxu0 %v3338_v26  ;;  %859 = vmatprep.mubr.bf16.mxu0 %v652_v32  ;;  %v1146_v1 = vrot.slane %v2877_v63, 2  ;;  %v1144_v7 = vrot.slane %v2876_v2, 2  ;;  %v4313_v26 = vld [vmem:[%s4968_s6 + $0xe0] sm:$0xff]  ;;  %v4355_v4 = vld [vmem:[%s4968_s6 + $0x48] sm:$0xff]  ;;  %v4379_v32 = vld [vmem:[%s4968_s6 + $0x38] sm:$0xff] }
 0x384   :  { %1314 = vmatprep.subr.bf16.mxu0 %v3344_v29  ;;  %3166 = vmatprep.subr.mxu1 %v4277_v12  ;;  %v4349_v29 = vld [vmem:[%s4968_s6 + $0xc8] sm:$0xff]  ;;  %v4361_v30 = vld [vmem:[%s4968_s6 + $0xc0] sm:$0xff] }
 0x385   :  { %v1147_v3 = vsel %vm1137_vm5, %v1142_v38, %v1146_v1  ;;  %v1145_v8 = vsel %vm1137_vm5, %v1139_v27, %v1144_v7  ;;  %3167 = vmatpush3.msra.mxu1 %v4283_v59  ;;  %v4331_v27 = vld [vmem:[%s4968_s6 + $0x58] sm:$0xff]  ;;  %v4397_v35 = vld [vmem:[%s4968_s6 + $0xa8] sm:$0xff]  ;;  %v4415_v38 = vld [vmem:[%s4968_s6 + $0x20] sm:$0xff] }
 0x386   :  { %1082 = vmatmul.mubr.bf16.gmra.mxu1 %v4152_v58  ;;  %v4289_v58 = vld [vmem:[%s4968_s6 + $0xf0] sm:$0xff]  ;;  %v4403_v36 = vld [vmem:[%s4968_s6 + $0x28] sm:$0xff] }
 0x387   :  { %1315 = vmatpush1.bf16.msra.mxu0 %v3342_v33  ;;  %3168 = vmatprep.subr.mxu1 %v4289_v58  ;;  %v4385_v33 = vld [vmem:[%s4968_s6 + $0xb0] sm:$0xff] }
 0x388   :  { %1316 = vmatprep.subr.bf16.mxu0 %v3347_v34  ;;  %3169 = vmatpush3.msra.mxu1 %v4295_v14  ;;  %v4391_v34 = vld [vmem:[%s4968_s6 + $0x30] sm:$0xff] }
 0x389   :  { %3170 = vmatprep.subr.mxu1 %v4301_v16 }
 0x38a   :  { %860 = vmatmul.mubr.bf16.gmra.mxu0 %v650_v39  ;;  %3171 = vmatpush3.msra.mxu1 %v4307_v24  ;;  %v4427_v39 = vld [vmem:[%s4968_s6 + $0x18] sm:$0xff] }
 0x38b   :  { %1317 = vmatpush1.bf16.msra.mxu0 %v3345_v37  ;;  %1344 = vmatprep.mubr.bf16.mxu0 %v1143_v20  ;;  %v4409_v37 = vld [vmem:[%s4968_s6 + $0xa0] sm:$0xff]  ;;  %v4433_v20 = vld [vmem:[%s4968_s6 + $0x90] sm:$0xff] }
 0x38c   :  { %1318 = vmatprep.subr.bf16.mxu0 %v3351_v9  ;;  %3172 = vmatprep.subr.mxu1 %v4313_v26  ;;  %v4421_v9 = vld [vmem:[%s4968_s6 + $0x98] sm:$0xff] }
 0x38d   :  { %3173 = vmatpush3.msra.mxu1 %v4319_v15 }
 0x38e   :  { %3174 = vmatprep.subr.mxu1 %v4325_v17 }
 0x38f   :  { %1319 = vmatpush1.bf16.msra.mxu0 %v3349_v40  ;;  %3175 = vmatpush3.msra.mxu1 %v4331_v27  ;;  %v4439_v40 = vld [vmem:[%s4968_s6 + $0x10] sm:$0xff] }
 0x390   :  { %1320 = vmatprep.subr.bf16.mxu0 %v3354_v10  ;;  %3176 = vmatprep.subr.mxu1 %v4337_v18  ;;  %v4444_v10 = vld [vmem:[%s4968_s6 + $0x88] sm:$0xff] }
 0x391   :  { %3177 = vmatpush3.msra.mxu1 %v4343_v28 }
 0x392   :  { %3178 = vmatprep.subr.mxu1 %v4349_v29 }
 0x393   :  { %1321 = vmatpush1.bf16.msra.mxu0 %v3352_v41  ;;  %3179 = vmatpush3.msra.mxu1 %v4355_v4  ;;  %v4449_v41 = vld [vmem:[%s4968_s6 + $0x8] sm:$0xff] }
 0x394   :  { %1322 = vmatprep.subr.bf16.mxu0 %v3357_v21  ;;  %3180 = vmatprep.subr.mxu1 %v4361_v30  ;;  %v4455_v21 = vld [vmem:[%s4968_s6 + $0x80] sm:$0xff] }
 0x397   :  { %1323 = vmatpush1.bf16.msra.mxu0 %v3355_v42  ;;  %v4461_v42 = vld [vmem:[%s4968_s6] sm:$0xff] }
 0x398   :  { %1324 = vmatprep.subr.bf16.mxu0 %v3360_v11  ;;  %4991 = vst [vmem:[#allocation11_spill] sm:$0xff] %v4461_v42 }
 0x39b   :  { %1325 = vmatpush1.bf16.msra.mxu0 %v3358_v43 }
 0x39c   :  { %1326 = vmatprep.subr.bf16.mxu0 %v3363_v22 }
 0x39f   :  { %1327 = vmatpush1.bf16.msra.mxu0 %v3361_v44 }
 0x3a0   :  { %1328 = vmatprep.subr.bf16.mxu0 %v3366_v13 }
 0x3a3   :  { %1329 = vmatpush2.bf16.msra.mxu0 %v3364_v25 }
 0x3a4   :  { %1330 = vmatprep.subr.bf16.mxu0 %v3369_v45 }
 0x3a7   :  { %1331 = vmatpush2.bf16.msra.mxu0 %v3367_v46 }
 0x3a8   :  { %1332 = vmatprep.subr.bf16.mxu0 %v3372_v47 }
 0x3ab   :  { %1333 = vmatpush2.bf16.msra.mxu0 %v3370_v49 }
 0x3ac   :  { %1334 = vmatprep.subr.bf16.mxu0 %v3375_v50 }
 0x3af   :  { %1335 = vmatpush2.bf16.msra.mxu0 %v3373_v51 }
 0x3b0   :  { %1336 = vmatprep.subr.bf16.mxu0 %v3378_v52 }
 0x3b3   :  { %1337 = vmatpush2.bf16.msra.mxu0 %v3376_v53 }
 0x3b4   :  { %1338 = vmatprep.subr.bf16.mxu0 %v3381_v54 }
 0x3b7   :  { %1339 = vmatpush2.bf16.msra.mxu0 %v3379_v55 }
 0x3b8   :  { %1340 = vmatprep.subr.bf16.mxu0 %v3384_v56 }
 0x3bb   :  { %1341 = vmatpush2.bf16.msra.mxu0 %v3382_v57 }
 0x3bc   :  { %1342 = vmatprep.subr.bf16.mxu0 %v3387_v61 }
 0x3bf   :  { %1343 = vmatpush2.bf16.msra.mxu0 %v3385_v0 }
 0x3c2   :  { %1345 = vmatmul.mubr.bf16.vlgmr.msra.gmra.mxu0 %v4171_v19  ;;  %v4367_v19 = vld [vmem:[%s4968_s6 + $0x40] sm:$0xff] }
 0x3c3   :  { %1354 = vmatprep.mubr.bf16.mxu0 %v1147_v3  ;;  %3181 = vmatpush3.msra.mxu1 %v4367_v19 }
 0x3c4   :  { %3182 = vmatprep.subr.mxu1 %v4373_v31 }
 0x3c5   :  { %3183 = vmatpush3.msra.mxu1 %v4379_v32 }
 0x3c6   :  { %3184 = vmatprep.subr.mxu1 %v4385_v33 }
 0x3c7   :  { %3185 = vmatpush3.msra.mxu1 %v4391_v34 }
 0x3c8   :  { %3186 = vmatprep.subr.mxu1 %v4397_v35 }
 0x3c9   :  { %3187 = vmatpush3.msra.mxu1 %v4403_v36 }
 0x3ca   :  { %1355 = vmatmul.mubr.bf16.gmra.mxu0 %v1145_v8  ;;  %3188 = vmatprep.subr.mxu1 %v4409_v37 }
 0x3cb   :  { %3189 = vmatpush3.msra.mxu1 %v4415_v38 }
 0x3cc   :  { %3190 = vmatprep.subr.mxu1 %v4421_v9 }
 0x3cd   :  { %3191 = vmatpush3.msra.mxu1 %v4427_v39 }
 0x3ce   :  { %3192 = vmatprep.subr.mxu1 %v4433_v20 }
 0x3cf   :  { %3193 = vmatpush3.msra.mxu1 %v4439_v40 }
 0x3d0   :  { %3194 = vmatprep.subr.mxu1 %v4444_v10 }
 0x3d1   :  { %3195 = vmatpush3.msra.mxu1 %v4449_v41 }
 0x3d2   :  { %3196 = vmatprep.subr.mxu1 %v4455_v21 }
 0x3d3   :  { %3197 = vmatpush3.msra.mxu1 %v4461_v42 }
 0x43e   :  { %v1073_v13 = vpop.f32.mrf.mxu1 }
 0x440   :  { %v1075_v45 = vpop.f32.mrf.mxu1 }
 0x442   :  { %v851_v11 = vpop.f32.mrf.mxu0  ;;  %v1077_v47 = vpop.f32.mrf.mxu1 }
 0x443   :  { %v1074_v61 = vadd.f32 %v1073_v13, %v851_v11 }
 0x444   :  { %v853_v43 = vpop.f32.mrf.mxu0  ;;  %v1079_v50 = vpop.f32.mrf.mxu1 }
 0x445   :  { %v1076_v2 = vadd.f32 %v1075_v45, %v853_v43 }
 0x446   :  { %v855_v22 = vpop.f32.mrf.mxu0  ;;  %v1083_v52 = vpop.f32.mrf.mxu1 }
 0x447   :  { %v1078_v57 = vadd.f32 %v1077_v47, %v855_v22 }
 0x448   :  { %v857_v44 = vpop.f32.mrf.mxu0  ;;  %v1085_v55 = vpop.f32.mrf.mxu1 }
 0x449   :  { %v1080_v63 = vadd.f32 %v1079_v50, %v857_v44 }
 0x44a   :  { %v861_v25 = vpop.f32.mrf.mxu0  ;;  %v1087_v3 = vpop.f32.mrf.mxu1 }
 0x44b   :  { %v1084_v0 = vadd.f32 %v1083_v52, %v861_v25 }
 0x44c   :  { %v863_v46 = vpop.f32.mrf.mxu0  ;;  %v1089_v44 = vpop.f32.mrf.mxu1 }
 0x44d   :  { %v1086_v8 = vadd.f32 %v1085_v55, %v863_v46 }
 0x44e   :  { %v865_v49 = vpop.f32.mrf.mxu0 }
 0x44f   :  { %v1088_v5 = vadd.f32 %v1087_v3, %v865_v49  ;;  %v4992_v3 = vmov 0.0  }
 0x450   :  { %v867_v51 = vpop.f32.mrf.mxu0 }
 0x451   :  { %v1090_v13 = vadd.f32 %v1089_v44, %v867_v51  ;;  %v4508_v44 = vld [vmem:[%s4969_s7] sm:$0xff] }
 0x482   :  { %v1346_v53 = vpop.f32.mrf.mxu0 }
 0x483   :  { %v4468_v62 = vadd.f32 %v1346_v53, %v1074_v61 }
 0x484   :  { %v1348_v54 = vpop.f32.mrf.mxu0 }
 0x485   :  { %v4474_v42 = vadd.f32 %v1348_v54, %v1076_v2 }
 0x486   :  { %v1350_v56 = vpop.f32.mrf.mxu0 }
 0x487   :  { %v4466_v1 = vadd.f32 %v1350_v56, %v1078_v57 }
 0x488   :  { %v1352_v60 = vpop.f32.mrf.mxu0 }
 0x489   :  { %v4470_v48 = vadd.f32 %v1352_v60, %v1080_v63  ;;  %v1373_v11 = vadd.f32 %v4466_v1, %v4468_v62 }
 0x48a   :  { %v1356_v7 = vpop.f32.mrf.mxu0 }
 0x48b   :  { %v4472_v23 = vadd.f32 %v1356_v7, %v1084_v0  ;;  %v1382_v25 = vadd.f32 %v4470_v48, %v4474_v42  ;;  %v1497_v7 = vld [vmem:[%s4969_s7 + $0x18] sm:$0xff] }
 0x48c   :  { %v1358_v6 = vpop.f32.mrf.mxu0  ;;  %1529 = vmatprep.subr.mxu1 %v1497_v7 }
 0x48d   :  { %v4478_v22 = vadd.f32 %v1358_v6, %v1086_v8  ;;  %v1374_v45 = vadd.f32 %v1373_v11, %v4472_v23  ;;  %v4497_v8 = vld [vmem:[%s4969_s7 + $0x10] sm:$0xff]  ;;  %v4503_v11 = vld [vmem:[%s4969_s7 + $0x8] sm:$0xff] }
 0x48e   :  { %v1360_v43 = vpop.f32.mrf.mxu0 }
 0x48f   :  { %v4483_v46 = vadd.f32 %v1360_v43, %v1088_v5  ;;  %v1383_v49 = vadd.f32 %v1382_v25, %v4478_v22 }
 0x490   :  { %v1362_v47 = vpop.f32.mrf.mxu0 }
 0x491   :  { %v1375_v50 = vadd.f32 %v1374_v45, %v4483_v46  ;;  %v4487_v52 = vadd.f32 %v1362_v47, %v1090_v13 }
 0x493   :  { %v1376_v53 = vrot.slane %v1375_v50, 4  ;;  %v1384_v6 = vadd.f32 %v1383_v49, %v4487_v52 }
 0x495   :  { %v1377_v54 = vadd.f32 %v1376_v53, %v1375_v50  ;;  %v1385_v55 = vrot.slane %v1384_v6, 4  ;;  %v3392_v50 = vld [vmem:[%s4972_s10 + $0x74] ss:$8 sps:$4 sm:$0xff]  }
 0x496   :  { %v3395_v53 = vld [vmem:[%s4972_s10 + $0x174] ss:$8 sps:$4 sm:$0xff]  }
 0x497   :  { %v1378_v51 = vrot.slane %v1377_v54, 2  ;;  %v1386_v56 = vadd.f32 %v1385_v55, %v1384_v6  ;;  %2137 = vmatprep.subr.bf16.mxu0 %v3395_v53  ;;  %v3399_v6 = vld [vmem:[%s4972_s10 + $0x160] ss:$8 sps:$4 sm:$0xff]   ;;  %v3405_v55 = vld [vmem:[%s4972_s10 + $0x150] ss:$8 sps:$4 sm:$0xff]  }
 0x498   :  { %v3465_v53 = vld [vmem:[%s4972_s10 + $0x1b0] ss:$8 sps:$4 sm:$0xff]  }
 0x499   :  { %v1379_v57 = vadd.f32 %v1378_v51, %v1377_v54  ;;  %v1387_v60 = vrot.slane %v1386_v56, 2  ;;  %v3401_v54 = vld [vmem:[%s4972_s10 + $0x164] ss:$8 sps:$4 sm:$0xff]   ;;  %v3407_v51 = vld [vmem:[%s4972_s10 + $0x154] ss:$8 sps:$4 sm:$0xff]  }
 0x49b   :  { %v1388_v61 = vadd.f32 %v1387_v60, %v1386_v56  ;;  %v1380_v63 = vrot.slane %v1379_v57, 1  ;;  %v3411_v56 = vld [vmem:[%s4972_s10 + $0x140] ss:$8 sps:$4 sm:$0xff]   ;;  %v3417_v60 = vld [vmem:[%s4972_s10 + $0x130] ss:$8 sps:$4 sm:$0xff]  }
 0x49d   :  { %v1389_v5 = vrot.slane %v1388_v61, 1  ;;  %v1381_v2 = vadd.f32 %v1380_v63, %v1379_v57  ;;  %v3413_v57 = vld [vmem:[%s4972_s10 + $0x144] ss:$8 sps:$4 sm:$0xff]   ;;  %v3423_v63 = vld [vmem:[%s4972_s10 + $0x120] ss:$8 sps:$4 sm:$0xff]  }
 0x49f   :  { %v1390_v0 = vadd.f32 %v1389_v5, %v1388_v61  ;;  %v3419_v61 = vld [vmem:[%s4972_s10 + $0x134] ss:$8 sps:$4 sm:$0xff]   ;;  %v3425_v5 = vld [vmem:[%s4972_s10 + $0x124] ss:$8 sps:$4 sm:$0xff]  }
 0x4a1   :  { %1487 = vmatprep.mubr.f32.mxu1 %v1390_v0  ;;  %v3429_v0 = vld [vmem:[%s4972_s10 + $0x110] ss:$8 sps:$4 sm:$0xff]  }
 0x4a2   :  { %1488 = vmatmul.mubr.f32.vlgmr.msra.gmra.mxu1 %v1381_v2  ;;  %v3431_v2 = vld [vmem:[%s4972_s10 + $0x114] ss:$8 sps:$4 sm:$0xff]  }
 0x4a3   :  { %1565 = vmatprep.mubr.f32.mxu1 %v4992_v3  ;;  %1530 = vmatpush1.msra.mxu1 %v4497_v8 }
 0x4a4   :  { %1531 = vmatprep.subr.mxu1 %v4503_v11 }
 0x4a5   :  { %1532 = vmatpush1.msra.mxu1 %v4508_v44 }
 0x4a6   :  { %3201 = vmatprep.subr.mxu1 %v4277_v12  ;;  %v4993_v12 = vld [vmem:[#allocation11_spill] sm:$0xff] }
 0x562   :  { %v3198_v43 = vpop.f32.mrf.mxu1 }
 0x564   :  { %v3199_v13 = vpop.f32.mrf.mxu1 }
 0x565   :  { %v3200_v25 = vadd.f32 %v3199_v13, %v3198_v43  ;;  %v3390_v43 = vld [vmem:[%s4972_s10 + $0x70] ss:$8 sps:$4 sm:$0xff]   ;;  %v3398_v13 = vld [vmem:[%s4972_s10 + $0x64] ss:$8 sps:$4 sm:$0xff]  }
 0x567   :  { %v1493_v45 = vmul.f32 0.001953125, %v3200_v25 }
 0x569   :  { %2910 = vmatmul.mubr.msk.f32.vlgmr.msra.gmra.mxu1 %vm173_vm0, %v1493_v45  ;;  %v3396_v45 = vld [vmem:[%s4972_s10 + $0x60] ss:$8 sps:$4 sm:$0xff]  }
 0x56a   :  { %3202 = vmatpush3.msra.mxu1 %v4283_v59 }
 0x56b   :  { %3203 = vmatprep.subr.mxu1 %v4289_v58  ;;  %v4994_v58 = vld [vmem:[#allocation7_spill] sm:$0xff] }
 0x56c   :  { %3204 = vmatpush3.msra.mxu1 %v4295_v14 }
 0x56d   :  { %3205 = vmatprep.subr.mxu1 %v4301_v16 }
 0x56e   :  { %3206 = vmatpush3.msra.mxu1 %v4307_v24 }
 0x56f   :  { %3207 = vmatprep.subr.mxu1 %v4313_v26 }
 0x570   :  { %3208 = vmatpush3.msra.mxu1 %v4319_v15 }
 0x571   :  { %3209 = vmatprep.subr.mxu1 %v4325_v17 }
 0x572   :  { %3210 = vmatpush3.msra.mxu1 %v4331_v27 }
 0x573   :  { %3211 = vmatprep.subr.mxu1 %v4337_v18 }
 0x574   :  { %3212 = vmatpush3.msra.mxu1 %v4343_v28 }
 0x575   :  { %3213 = vmatprep.subr.mxu1 %v4349_v29 }
 0x576   :  { %3214 = vmatpush3.msra.mxu1 %v4355_v4 }
 0x577   :  { %3215 = vmatprep.subr.mxu1 %v4361_v30 }
 0x578   :  { %3216 = vmatpush3.msra.mxu1 %v4367_v19 }
 0x579   :  { %3217 = vmatprep.subr.mxu1 %v4373_v31 }
 0x57a   :  { %3218 = vmatpush3.msra.mxu1 %v4379_v32 }
 0x57b   :  { %3219 = vmatprep.subr.mxu1 %v4385_v33 }
 0x57c   :  { %3220 = vmatpush3.msra.mxu1 %v4391_v34 }
 0x57d   :  { %3221 = vmatprep.subr.mxu1 %v4397_v35 }
 0x57e   :  { %3222 = vmatpush3.msra.mxu1 %v4403_v36 }
 0x57f   :  { %3223 = vmatprep.subr.mxu1 %v4409_v37 }
 0x580   :  { %3224 = vmatpush3.msra.mxu1 %v4415_v38 }
 0x581   :  { %3225 = vmatprep.subr.mxu1 %v4421_v9 }
 0x582   :  { %3226 = vmatpush3.msra.mxu1 %v4427_v39 }
 0x583   :  { %3227 = vmatprep.subr.mxu1 %v4433_v20 }
 0x584   :  { %3228 = vmatpush3.msra.mxu1 %v4439_v40 }
 0x585   :  { %3229 = vmatprep.subr.mxu1 %v4444_v10 }
 0x586   :  { %3230 = vmatpush3.msra.mxu1 %v4449_v41 }
 0x587   :  { %3231 = vmatprep.subr.mxu1 %v4455_v21 }
 0x588   :  { %3232 = vmatpush3.msra.mxu1 %v4993_v12  ;;  %v3404_v12 = vld [vmem:[%s4972_s10 + $0x54] ss:$8 sps:$4 sm:$0xff]  }
 0x589   :  { %1718 = vmatprep.subr.mxu1 %v1497_v7 }
 0x629   :  { %v1567_v59 = vpop.f32.mrf.mxu1 }
 0x62a   :  { %v1575_v14 = vrot.slane %v1567_v59, %v4994_v58  ;;  %v3402_v59 = vld [vmem:[%s4972_s10 + $0x50] ss:$8 sps:$4 sm:$0xff]  }
 0x62b   :  { %v1569_v16 = vpop.f32.mrf.mxu1 }
 0x62c   :  { %v4547_v24 = vsub.f32 %v4468_v62, %v1575_v14  ;;  %v4550_v26 = vsub.f32 %v4466_v1, %v1575_v14  ;;  %v4553_v15 = vsub.f32 %v4472_v23, %v1575_v14  ;;  %v1579_v17 = vrot.slane %v1569_v16, %v4994_v58  ;;  %v3408_v16 = vld [vmem:[%s4972_s10 + $0x40] ss:$8 sps:$4 sm:$0xff]  }
 0x62d   :  { %v4557_v27 = vsub.f32 %v4483_v46, %v1575_v14  ;;  %v3410_v14 = vld [vmem:[%s4972_s10 + $0x44] ss:$8 sps:$4 sm:$0xff]  }
 0x62e   :  { %v1588_v18 = vmul.f32 %v4547_v24, %v4547_v24  ;;  %v1590_v28 = vmul.f32 %v4550_v26, %v4550_v26  ;;  %v4564_v62 = vsub.f32 %v4474_v42, %v1579_v17  ;;  %v4567_v29 = vsub.f32 %v4470_v48, %v1579_v17 }
 0x62f   :  { %v4570_v23 = vsub.f32 %v4478_v22, %v1579_v17  ;;  %v1592_v4 = vmul.f32 %v4553_v15, %v4553_v15  ;;  %v4575_v19 = vsub.f32 %v4487_v52, %v1579_v17  ;;  %v1594_v48 = vmul.f32 %v4557_v27, %v4557_v27  ;;  %v3393_v52 = vld [vmem:[%s4972_s10 + $0x170] ss:$8 sps:$4 sm:$0xff]   ;;  %v3416_v17 = vld [vmem:[%s4972_s10 + $0x34] ss:$8 sps:$4 sm:$0xff]  }
 0x630   :  { %v1596_v30 = vadd.f32 %v1590_v28, %v1588_v18  ;;  %v1589_v31 = vmul.f32 %v4564_v62, %v4564_v62  ;;  %v1591_v32 = vmul.f32 %v4567_v29, %v4567_v29  ;;  %2138 = vmatpush1.bf16.msra.mxu0 %v3393_v52  ;;  %v3414_v18 = vld [vmem:[%s4972_s10 + $0x30] ss:$8 sps:$4 sm:$0xff]   ;;  %v3422_v28 = vld [vmem:[%s4972_s10 + $0x24] ss:$8 sps:$4 sm:$0xff]   ;;  %v3467_v52 = vld [vmem:[%s4972_s10 + $0x1b4] ss:$8 sps:$4 sm:$0xff]  }
 0x631   :  { %v1593_v34 = vmul.f32 %v4570_v23, %v4570_v23  ;;  %v1595_v37 = vmul.f32 %v4575_v19, %v4575_v19  ;;  %2139 = vmatprep.subr.bf16.mxu0 %v3401_v54  ;;  %v3468_v54 = vld [vmem:[%s4972_s10 + $0xa0] ss:$8 sps:$4 sm:$0xff]  }
 0x632   :  { %v1597_v33 = vadd.f32 %v1596_v30, %v1592_v4  ;;  %v1605_v35 = vadd.f32 %v1591_v32, %v1589_v31  ;;  %v3420_v4 = vld [vmem:[%s4972_s10 + $0x20] ss:$8 sps:$4 sm:$0xff]   ;;  %v3428_v30 = vld [vmem:[%s4972_s10 + $0x14] ss:$8 sps:$4 sm:$0xff]   ;;  %v3426_v31 = vld [vmem:[%s4972_s10 + $0x10] ss:$8 sps:$4 sm:$0xff]  }
 0x633   :  { %v3434_v32 = vld [vmem:[%s4972_s10 + $0x4] ss:$8 sps:$4 sm:$0xff]  }
 0x634   :  { %v1598_v36 = vadd.f32 %v1597_v33, %v1594_v48  ;;  %v1606_v38 = vadd.f32 %v1605_v35, %v1593_v34  ;;  %2140 = vmatpush1.bf16.msra.mxu0 %v3399_v6  ;;  %v3432_v48 = vld [vmem:[%s4972_s10] ss:$8 sps:$4 sm:$0xff]   ;;  %v3437_v33 = vld [vmem:[%s4972_s10 + $0x104] ss:$8 sps:$4 sm:$0xff]   ;;  %v3440_v35 = vld [vmem:[%s4972_s10 + $0xf4] ss:$8 sps:$4 sm:$0xff]  }
 0x635   :  { %2141 = vmatprep.subr.bf16.mxu0 %v3407_v51  ;;  %v3435_v34 = vld [vmem:[%s4972_s10 + $0x100] ss:$8 sps:$4 sm:$0xff]   ;;  %v3470_v6 = vld [vmem:[%s4972_s10 + $0xa4] ss:$8 sps:$4 sm:$0xff]  }
 0x636   :  { %v1599_v9 = vrot.slane %v1598_v36, 4  ;;  %v1607_v39 = vadd.f32 %v1606_v38, %v1595_v37  ;;  %v3443_v37 = vld [vmem:[%s4972_s10 + $0x1f4] ss:$8 sps:$4 sm:$0xff]   ;;  %v3441_v38 = vld [vmem:[%s4972_s10 + $0x1f0] ss:$8 sps:$4 sm:$0xff]  }
 0x637   :  { %v3471_v51 = vld [vmem:[%s4972_s10 + $0x1a0] ss:$8 sps:$4 sm:$0xff]  }
 0x638   :  { %v1600_v20 = vadd.f32 %v1599_v9, %v1598_v36  ;;  %v1608_v40 = vrot.slane %v1607_v39, 4  ;;  %2142 = vmatpush1.bf16.msra.mxu0 %v3405_v55  ;;  %v3438_v36 = vld [vmem:[%s4972_s10 + $0xf0] ss:$8 sps:$4 sm:$0xff]   ;;  %v3446_v9 = vld [vmem:[%s4972_s10 + $0xe4] ss:$8 sps:$4 sm:$0xff]  }
 0x639   :  { %2143 = vmatprep.subr.bf16.mxu0 %v3413_v57  ;;  %v3473_v55 = vld [vmem:[%s4972_s10 + $0x1a4] ss:$8 sps:$4 sm:$0xff]   ;;  %v3474_v57 = vld [vmem:[%s4972_s10 + $0x90] ss:$8 sps:$4 sm:$0xff]  }
 0x63a   :  { %v1601_v10 = vrot.slane %v1600_v20, 2  ;;  %v1609_v41 = vadd.f32 %v1608_v40, %v1607_v39  ;;  %v3444_v39 = vld [vmem:[%s4972_s10 + $0xe0] ss:$8 sps:$4 sm:$0xff]  }
 0x63b   :  { %v3447_v40 = vld [vmem:[%s4972_s10 + $0x1e0] ss:$8 sps:$4 sm:$0xff]  }
 0x63c   :  { %v1602_v21 = vadd.f32 %v1601_v10, %v1600_v20  ;;  %v1610_v42 = vrot.slane %v1609_v41, 2  ;;  %2144 = vmatpush1.bf16.msra.mxu0 %v3411_v56  ;;  %v3449_v20 = vld [vmem:[%s4972_s10 + $0x1e4] ss:$8 sps:$4 sm:$0xff]   ;;  %v3452_v10 = vld [vmem:[%s4972_s10 + $0xd4] ss:$8 sps:$4 sm:$0xff]  }
 0x63d   :  { %2145 = vmatprep.subr.bf16.mxu0 %v3419_v61  ;;  %v3476_v56 = vld [vmem:[%s4972_s10 + $0x94] ss:$8 sps:$4 sm:$0xff]  }
 0x63e   :  { %v1611_v1 = vadd.f32 %v1610_v42, %v1609_v41  ;;  %v1603_v22 = vrot.slane %v1602_v21, 1  ;;  %v3450_v41 = vld [vmem:[%s4972_s10 + $0xd0] ss:$8 sps:$4 sm:$0xff]   ;;  %v3479_v61 = vld [vmem:[%s4972_s10 + $0x194] ss:$8 sps:$4 sm:$0xff]  }
 0x63f   :  { %v3453_v42 = vld [vmem:[%s4972_s10 + $0x1d0] ss:$8 sps:$4 sm:$0xff]  }
 0x640   :  { %v1612_v46 = vrot.slane %v1611_v1, 1  ;;  %v1604_v49 = vadd.f32 %v1603_v22, %v1602_v21  ;;  %2146 = vmatpush1.bf16.msra.mxu0 %v3417_v60  ;;  %v3455_v21 = vld [vmem:[%s4972_s10 + $0x1d4] ss:$8 sps:$4 sm:$0xff]   ;;  %v3456_v22 = vld [vmem:[%s4972_s10 + $0xc0] ss:$8 sps:$4 sm:$0xff]  }
 0x641   :  { %2147 = vmatprep.subr.bf16.mxu0 %v3425_v5  ;;  %v3477_v60 = vld [vmem:[%s4972_s10 + $0x190] ss:$8 sps:$4 sm:$0xff]   ;;  %v3482_v5 = vld [vmem:[%s4972_s10 + $0x84] ss:$8 sps:$4 sm:$0xff]  }
 0x642   :  { %v1613_v47 = vadd.f32 %v1612_v46, %v1611_v1  ;;  %v3458_v1 = vld [vmem:[%s4972_s10 + $0xc4] ss:$8 sps:$4 sm:$0xff]  }
 0x643   :  { %v3461_v46 = vld [vmem:[%s4972_s10 + $0x1c4] ss:$8 sps:$4 sm:$0xff]  }
 0x644   :  { %1678 = vmatprep.mubr.f32.mxu1 %v1613_v47  ;;  %2148 = vmatpush1.bf16.msra.mxu0 %v3423_v63  ;;  %v3459_v47 = vld [vmem:[%s4972_s10 + $0x1c0] ss:$8 sps:$4 sm:$0xff]  }
 0x645   :  { %1679 = vmatmul.mubr.f32.vlgmr.msra.gmra.mxu1 %v1604_v49  ;;  %2149 = vmatprep.subr.bf16.mxu0 %v3431_v2  ;;  %v3464_v49 = vld [vmem:[%s4972_s10 + $0xb4] ss:$8 sps:$4 sm:$0xff]   ;;  %v3480_v63 = vld [vmem:[%s4972_s10 + $0x80] ss:$8 sps:$4 sm:$0xff]  }
 0x646   :  { %1719 = vmatpush1.msra.mxu1 %v4497_v8  ;;  %1754 = vmatprep.mubr.f32.mxu1 %v4992_v3  ;;  %v3483_v2 = vld [vmem:[%s4972_s10 + $0x180] ss:$8 sps:$4 sm:$0xff]  }
 0x647   :  { %1720 = vmatprep.subr.mxu1 %v4503_v11 }
 0x648   :  { %1721 = vmatpush1.msra.mxu1 %v4508_v44  ;;  %2150 = vmatpush1.bf16.msra.mxu0 %v3429_v0  ;;  %v3485_v0 = vld [vmem:[%s4972_s10 + $0x184] ss:$8 sps:$4 sm:$0xff]  }
 0x649   :  { %2359 = vmatprep.subr.bf16.mxu1 %v3392_v50  ;;  %2151 = vmatprep.subr.bf16.mxu0 %v3437_v33  ;;  %v3462_v50 = vld [vmem:[%s4972_s10 + $0xb0] ss:$8 sps:$4 sm:$0xff]  }
 0x64c   :  { %2152 = vmatpush1.bf16.msra.mxu0 %v3435_v34 }
 0x64d   :  { %2153 = vmatprep.subr.bf16.mxu0 %v3443_v37 }
 0x650   :  { %2154 = vmatpush2.bf16.msra.mxu0 %v3441_v38 }
 0x651   :  { %2155 = vmatprep.subr.bf16.mxu0 %v3449_v20 }
 0x654   :  { %2156 = vmatpush2.bf16.msra.mxu0 %v3447_v40 }
 0x655   :  { %2157 = vmatprep.subr.bf16.mxu0 %v3455_v21 }
 0x658   :  { %2158 = vmatpush2.bf16.msra.mxu0 %v3453_v42 }
 0x659   :  { %2159 = vmatprep.subr.bf16.mxu0 %v3461_v46 }
 0x65c   :  { %2160 = vmatpush2.bf16.msra.mxu0 %v3459_v47 }
 0x65d   :  { %2161 = vmatprep.subr.bf16.mxu0 %v3467_v52 }
 0x660   :  { %2162 = vmatpush2.bf16.msra.mxu0 %v3465_v53  ;;  %v3535_v53 = vld [vmem:[%s4972_s10 + $0x284] ss:$8 sps:$4 sm:$0xff]  }
 0x661   :  { %2163 = vmatprep.subr.bf16.mxu0 %v3473_v55 }
 0x664   :  { %2164 = vmatpush2.bf16.msra.mxu0 %v3471_v51 }
 0x665   :  { %2165 = vmatprep.subr.bf16.mxu0 %v3479_v61 }
 0x668   :  { %2166 = vmatpush2.bf16.msra.mxu0 %v3477_v60 }
 0x669   :  { %2167 = vmatprep.subr.bf16.mxu0 %v3485_v0 }
 0x66c   :  { %2168 = vmatpush2.bf16.msra.mxu0 %v3483_v2 }
 0x705   :  { %v3233_v3 = vpop.f32.mrf.mxu1 }
 0x707   :  { %v3234_v7 = vpop.f32.mrf.mxu1 }
 0x708   :  { %v3235_v8 = vadd.f32 %v3234_v7, %v3233_v3  ;;  %v3488_v3 = vld [vmem:[%s4972_s10 + $0x274] ss:$8 sps:$4 sm:$0xff]  }
 0x709   :  { %2631 = vmatprep.subr.bf16.mxu0 %v3488_v3 }
 0x70a   :  { %v1684_v11 = vmul.f32 0.001953125, %v3235_v8 }
 0x70c   :  { %v1685_v44 = vadd.f32 1e-05, %v1684_v11 }
 0x70e   :  { %3540 = vrsqrt.f32 %v1685_v44  ;;  %v4995_v44 = vld [vmem:[#allocation8_spill] sm:$0xff] }
 0x71b   :  { %v3541_v25 = vpop.eup %3540 }
 0x71c   :  { %2911 = vmatmul.mubr.msk.f32.vlgmr.msra.gmra.mxu1 %vm173_vm0, %v3541_v25 }
 0x71d   :  { %2360 = vmatpush1.bf16.msra.mxu1 %v3390_v43 }
 0x71e   :  { %2361 = vmatprep.subr.bf16.mxu1 %v3398_v13  ;;  %v1761_v13 = vld [vmem:[%s4970_s8] sm:$0x3] }
 0x721   :  { %2362 = vmatpush1.bf16.msra.mxu1 %v3396_v45  ;;  %v1800_v45 = vld [vmem:[%s4971_s9] sm:$0x3] }
 0x722   :  { %2363 = vmatprep.subr.bf16.mxu1 %v3404_v12 }
 0x725   :  { %2364 = vmatpush1.bf16.msra.mxu1 %v3402_v59  ;;  %v4996_v59 = vld [vmem:[#allocation9_spill] sm:$0xff] }
 0x726   :  { %2365 = vmatprep.subr.bf16.mxu1 %v3410_v14  ;;  %v1809_v14 = vrot.slane %v1800_v45, %v4996_v59 }
 0x729   :  { %2366 = vmatpush1.bf16.msra.mxu1 %v3408_v16 }
 0x72a   :  { %2367 = vmatprep.subr.bf16.mxu1 %v3416_v17 }
 0x72d   :  { %2368 = vmatpush1.bf16.msra.mxu1 %v3414_v18  ;;  %v1805_v18 = vrot.slane %v1800_v45, %v4994_v58 }
 0x72e   :  { %2369 = vmatprep.subr.bf16.mxu1 %v3422_v28 }
 0x731   :  { %2370 = vmatpush1.bf16.msra.mxu1 %v3420_v4 }
 0x732   :  { %2371 = vmatprep.subr.bf16.mxu1 %v3428_v30 }
 0x735   :  { %2372 = vmatpush1.bf16.msra.mxu1 %v3426_v31 }
 0x736   :  { %2373 = vmatprep.subr.bf16.mxu1 %v3434_v32 }
 0x739   :  { %2374 = vmatpush1.bf16.msra.mxu1 %v3432_v48 }
 0x73a   :  { %2375 = vmatprep.subr.bf16.mxu1 %v3440_v35 }
 0x73d   :  { %2376 = vmatpush2.bf16.msra.mxu1 %v3438_v36 }
 0x73e   :  { %2377 = vmatprep.subr.bf16.mxu1 %v3446_v9 }
 0x741   :  { %2378 = vmatpush2.bf16.msra.mxu1 %v3444_v39 }
 0x742   :  { %2379 = vmatprep.subr.bf16.mxu1 %v3452_v10 }
 0x745   :  { %2380 = vmatpush2.bf16.msra.mxu1 %v3450_v41 }
 0x746   :  { %2381 = vmatprep.subr.bf16.mxu1 %v3458_v1 }
 0x749   :  { %2382 = vmatpush2.bf16.msra.mxu1 %v3456_v22 }
 0x74a   :  { %2383 = vmatprep.subr.bf16.mxu1 %v3464_v49 }
 0x74d   :  { %2384 = vmatpush2.bf16.msra.mxu1 %v3462_v50 }
 0x74e   :  { %2385 = vmatprep.subr.bf16.mxu1 %v3470_v6 }
 0x751   :  { %2386 = vmatpush2.bf16.msra.mxu1 %v3468_v54 }
 0x752   :  { %2387 = vmatprep.subr.bf16.mxu1 %v3476_v56 }
 0x755   :  { %2388 = vmatpush2.bf16.msra.mxu1 %v3474_v57 }
 0x756   :  { %2389 = vmatprep.subr.bf16.mxu1 %v3482_v5 }
 0x759   :  { %2390 = vmatpush2.bf16.msra.mxu1 %v3480_v63 }
 0x7dc   :  { %v1756_v7 = vpop.f32.mrf.mxu1 }
 0x7de   :  { %v1758_v8 = vpop.f32.mrf.mxu1 }
 0x7df   :  { %v1764_v11 = vcombine.low %v1756_v7, %v1758_v8 }
 0x7e1   :  { %v1771_v43 = vrot.slane %v1764_v11, %v4995_v44 }
 0x7e3   :  { %v1778_v25 = vrot.slane %v1771_v43, %v4995_v44 }
 0x7e5   :  { %v1780_v12 = vmul.f32 %v1778_v25, %v1761_v13  ;;  %v3486_v13 = vld [vmem:[%s4972_s10 + $0x270] ss:$8 sps:$4 sm:$0xff]  }
 0x7e7   :  { %v1785_v16 = vrot.slane %v1780_v12, %v4994_v58  ;;  %v1789_v17 = vrot.slane %v1780_v12, %v4996_v59 }
 0x7e9   :  { %v1792_v28 = vmul.f32 %v1785_v16, %v4547_v24  ;;  %v1793_v4 = vmul.f32 %v1789_v17, %v4564_v62  ;;  %v1794_v30 = vmul.f32 %v1785_v16, %v4550_v26  ;;  %v1795_v31 = vmul.f32 %v1789_v17, %v4567_v29 }
 0x7ea   :  { %v1796_v32 = vmul.f32 %v1785_v16, %v4553_v15  ;;  %v1797_v48 = vmul.f32 %v1789_v17, %v4570_v23  ;;  %v1798_v33 = vmul.f32 %v1785_v16, %v4557_v27  ;;  %v1799_v34 = vmul.f32 %v1789_v17, %v4575_v19  ;;  %v3492_v16 = vld [vmem:[%s4972_s10 + $0x264] ss:$8 sps:$4 sm:$0xff]  }
 0x7eb   :  { %v1812_v35 = vadd.f32 %v1805_v18, %v1792_v28  ;;  %v1813_v36 = vadd.f32 %v1809_v14, %v1793_v4  ;;  %v1814_v37 = vadd.f32 %v1805_v18, %v1794_v30  ;;  %v1815_v58 = vadd.f32 %v1809_v14, %v1795_v31  ;;  %v3490_v31 = vld [vmem:[%s4972_s10 + $0x260] ss:$8 sps:$4 sm:$0xff]  }
 0x7ec   :  { %v1816_v38 = vadd.f32 %v1805_v18, %v1796_v32  ;;  %v1817_v24 = vadd.f32 %v1809_v14, %v1797_v48  ;;  %v1818_v9 = vadd.f32 %v1805_v18, %v1798_v33  ;;  %v1819_v62 = vadd.f32 %v1809_v14, %v1799_v34  ;;  %v3495_v32 = vld [vmem:[%s4972_s10 + $0x254] ss:$8 sps:$4 sm:$0xff]   ;;  %v3493_v34 = vld [vmem:[%s4972_s10 + $0x250] ss:$8 sps:$4 sm:$0xff]  }
 0x7ed   :  { %v1820_v39 = vmax.f32 %v1812_v35, 0.0  ;;  %v1821_v26 = vmax.f32 %v1813_v36, 0.0  ;;  %v1822_v20 = vmax.f32 %v1814_v37, 0.0  ;;  %v1823_v29 = vmax.f32 %v1815_v58, 0.0  ;;  %v3499_v36 = vld [vmem:[%s4972_s10 + $0x244] ss:$8 sps:$4 sm:$0xff]  }
 0x7ee   :  { %v1824_v40 = vmax.f32 %v1816_v38, 0.0  ;;  %v1825_v15 = vmax.f32 %v1817_v24, 0.0  ;;  %v1826_v10 = vmax.f32 %v1818_v9, 0.0  ;;  %v1827_v23 = vmax.f32 %v1819_v62, 0.0  ;;  %v3497_v38 = vld [vmem:[%s4972_s10 + $0x240] ss:$8 sps:$4 sm:$0xff]  }
 0x7ef   :  { %v3092_v41 = vpack.c.bf16 %v1821_v26, %v1820_v39  ;;  %v3093_v27 = vpack.c.bf16 %v1823_v29, %v1822_v20  ;;  %v3502_v24 = vld [vmem:[%s4972_s10 + $0x234] ss:$8 sps:$4 sm:$0xff]   ;;  %v3500_v9 = vld [vmem:[%s4972_s10 + $0x230] ss:$8 sps:$4 sm:$0xff]   ;;  %v3505_v62 = vld [vmem:[%s4972_s10 + $0x224] ss:$8 sps:$4 sm:$0xff]  }
 0x7f0   :  { %v3094_v21 = vpack.c.bf16 %v1825_v15, %v1824_v40  ;;  %v3095_v19 = vpack.c.bf16 %v1827_v23, %v1826_v10  ;;  %v3503_v39 = vld [vmem:[%s4972_s10 + $0x220] ss:$8 sps:$4 sm:$0xff]   ;;  %v3508_v26 = vld [vmem:[%s4972_s10 + $0x214] ss:$8 sps:$4 sm:$0xff]   ;;  %v3506_v20 = vld [vmem:[%s4972_s10 + $0x210] ss:$8 sps:$4 sm:$0xff]  }
 0x7f1   :  { %v1850_v42 = vrot.slane %v3092_v41, 7  ;;  %v1852_v1 = vrot.slane %v3093_v27, 7  ;;  %v3511_v29 = vld [vmem:[%s4972_s10 + $0x204] ss:$8 sps:$4 sm:$0xff]   ;;  %v3509_v40 = vld [vmem:[%s4972_s10 + $0x200] ss:$8 sps:$4 sm:$0xff]  }
 0x7f2   :  { %v1855_v22 = vrot.slane %v3094_v21, 7  ;;  %v1858_v46 = vrot.slane %v3095_v19, 7  ;;  %v3514_v15 = vld [vmem:[%s4972_s10 + $0x2f4] ss:$8 sps:$4 sm:$0xff]   ;;  %v3512_v10 = vld [vmem:[%s4972_s10 + $0x2f0] ss:$8 sps:$4 sm:$0xff]  }
 0x7f3   :  { %v1851_v47 = vrot.slane %v1850_v42, 4  ;;  %v1854_v49 = vrot.slane %v1852_v1, 4  ;;  %1866 = vst [vmem:[#allocation3] sm:$0xee] %v1850_v42  ;;  %v3517_v23 = vld [vmem:[%s4972_s10 + $0x2e4] ss:$8 sps:$4 sm:$0xff]  }
 0x7f4   :  { %v1857_v50 = vrot.slane %v1855_v22, 4  ;;  %v1860_v52 = vrot.slane %v1858_v46, 4  ;;  %v3515_v41 = vld [vmem:[%s4972_s10 + $0x2e0] ss:$8 sps:$4 sm:$0xff]   ;;  %v3520_v27 = vld [vmem:[%s4972_s10 + $0x2d4] ss:$8 sps:$4 sm:$0xff]  }
 0x7f5   :  { %v1853_v6 = vsel %vm4142_vm3, %v1851_v47, %v1852_v1  ;;  %v1856_v54 = vsel %vm4142_vm3, %v1854_v49, %v1855_v22  ;;  %v3518_v21 = vld [vmem:[%s4972_s10 + $0x2d0] ss:$8 sps:$4 sm:$0xff]   ;;  %v3523_v19 = vld [vmem:[%s4972_s10 + $0x2c4] ss:$8 sps:$4 sm:$0xff]   ;;  %v3521_v42 = vld [vmem:[%s4972_s10 + $0x2c0] ss:$8 sps:$4 sm:$0xff]  }
 0x7f6   :  { %v1859_v55 = vsel %vm4142_vm3, %v1857_v50, %v1858_v46  ;;  %1870 = vst [vmem:[#allocation3 + $0x20] sm:$0x11] %v1860_v52  ;;  %v3526_v1 = vld [vmem:[%s4972_s10 + $0x2b4] ss:$8 sps:$4 sm:$0xff]   ;;  %v3524_v22 = vld [vmem:[%s4972_s10 + $0x2b0] ss:$8 sps:$4 sm:$0xff]  }
 0x7f7   :  { %v4813_v51 = vcombine.low %v1856_v54, %v1859_v55  ;;  %v4815_v56 = vcombine.high %v1856_v54, %v1859_v55  ;;  %v3529_v46 = vld [vmem:[%s4972_s10 + $0x2a4] ss:$8 sps:$4 sm:$0xff]   ;;  %v3527_v47 = vld [vmem:[%s4972_s10 + $0x2a0] ss:$8 sps:$4 sm:$0xff]   ;;  %v3532_v49 = vld [vmem:[%s4972_s10 + $0x294] ss:$8 sps:$4 sm:$0xff]  }
 0x7f8   :  { %v3530_v50 = vld [vmem:[%s4972_s10 + $0x290] ss:$8 sps:$4 sm:$0xff]   ;;  %v3533_v54 = vld [vmem:[%s4972_s10 + $0x280] ss:$8 sps:$4 sm:$0xff]  }
 0x7f9   :  { %v1967_v11 = vrot.slane %v4815_v56, 1  ;;  %v1964_v44 = vrot.slane %v4813_v51, 1  ;;  %v2458_v12 = vrot.slane %v4813_v51, 2  ;;  %v2461_v35 = vrot.slane %v4815_v56, 2 }
 0x7fa   :  { %v1871_v57 = vld [vmem:[#allocation3] sm:$0xff] }
 0x7fb   :  { %v1907_v60 = vld [vmem:[#allocation3] sm:$0xee]  ;;  %v2986_v63 = vcombine.low %v1871_v57, %v1853_v6  ;;  %v2987_v5 = vcombine.high %v1871_v57, %v1853_v6 }
 0x7fc   :  { %v2412_v61 = vld [vmem:[#allocation3] sm:$0xcc]  ;;  %v2948_v0 = vcombine.low %v1907_v60, %v1853_v6  ;;  %v2949_v2 = vcombine.high %v1907_v60, %v1853_v6 }
 0x7fd   :  { %v3052_v3 = vcombine.low %v2412_v61, %v1853_v6  ;;  %2391 = vmatprep.mubr.bf16.mxu1 %v2987_v5  ;;  %v1908_v43 = vld [vmem:[#allocation3 + $0x20] sm:$0x11]  ;;  %v3053_v4 = vcombine.high %v2412_v61, %v1853_v6 }
 0x7fe   :  { %v1963_v7 = vrot.slane %v2948_v0, 1  ;;  %v1966_v8 = vrot.slane %v2949_v2, 1  ;;  %2392 = vmatmul.mubr.bf16.vlgmr.msra.gmra.mxu1 %v2986_v63  ;;  %v2953_v25 = vcombine.high %v1908_v43, %v1908_v43  ;;  %v2952_v18 = vcombine.low %v1908_v43, %v1908_v43  ;;  %v2413_v52 = vld [vmem:[#allocation3 + $0x20] sm:$0x33] }
 0x7ff   :  { %v2457_v45 = vrot.slane %v3052_v3, 2  ;;  %2401 = vmatprep.mubr.bf16.mxu1 %v4815_v56  ;;  %v2460_v33 = vrot.slane %v3053_v4, 2  ;;  %v3055_v6 = vcombine.high %v2413_v52, %v2413_v52  ;;  %v3054_v57 = vcombine.low %v2413_v52, %v2413_v52 }
 0x800   :  { %v1968_v59 = vsel %vm642_vm4, %v1966_v8, %v1967_v11  ;;  %v1965_v14 = vsel %vm642_vm4, %v1963_v7, %v1964_v44  ;;  %v1971_v17 = vrot.slane %v2953_v25, 1  ;;  %v1969_v48 = vrot.slane %v2952_v18, 1  ;;  %v2693_v18 = vld [vmem:[%s4962_s0 + $0x8] sm:$0xff] }
 0x801   :  { %2169 = vmatprep.mubr.bf16.mxu0 %v1968_v59  ;;  %v4832_v28 = vsel %vm1137_vm5, %v2457_v45, %v2458_v12  ;;  %v2462_v58 = vsel %vm1137_vm5, %v2460_v33, %v2461_v35  ;;  %v2465_v55 = vrot.slane %v3055_v6, 2  ;;  %v2463_v61 = vrot.slane %v3054_v57, 2 }
 0x802   :  { %2170 = vmatmul.mubr.bf16.vlgmr.msra.gmra.mxu0 %v1965_v14  ;;  %v1972_v30 = vsel %vm642_vm4, %v1967_v11, %v1971_v17  ;;  %v1970_v37 = vsel %vm642_vm4, %v1964_v44, %v1969_v48  ;;  %v2694_v48 = vld [vmem:[%s4962_s0 + $0x10] sm:$0xff] }
 0x803   :  { %2632 = vmatpush1.bf16.msra.mxu0 %v3486_v13  ;;  %2179 = vmatprep.mubr.bf16.mxu0 %v1972_v30  ;;  %v2466_v60 = vsel %vm1137_vm5, %v2461_v35, %v2465_v55  ;;  %v2464_v63 = vsel %vm1137_vm5, %v2458_v12, %v2463_v61 }
 0x804   :  { %2633 = vmatprep.subr.bf16.mxu0 %v3492_v16 }
 0x806   :  { %2402 = vmatmul.mubr.bf16.gmra.mxu1 %v4813_v51  ;;  %v2692_v51 = vld [vmem:[%s4962_s0] sm:$0xff] }
 0x807   :  { %2634 = vmatpush1.bf16.msra.mxu0 %v3490_v31 }
 0x808   :  { %2635 = vmatprep.subr.bf16.mxu0 %v3495_v32 }
 0x80a   :  { %2180 = vmatmul.mubr.bf16.gmra.mxu0 %v1970_v37  ;;  %v2695_v37 = vld [vmem:[%s4962_s0 + $0x18] sm:$0xff] }
 0x80b   :  { %2636 = vmatpush1.bf16.msra.mxu0 %v3493_v34  ;;  %2663 = vmatprep.mubr.bf16.mxu0 %v2462_v58 }
 0x80c   :  { %2637 = vmatprep.subr.bf16.mxu0 %v3499_v36 }
 0x80f   :  { %2638 = vmatpush1.bf16.msra.mxu0 %v3497_v38 }
 0x810   :  { %2639 = vmatprep.subr.bf16.mxu0 %v3502_v24 }
 0x813   :  { %2640 = vmatpush1.bf16.msra.mxu0 %v3500_v9 }
 0x814   :  { %2641 = vmatprep.subr.bf16.mxu0 %v3505_v62 }
 0x817   :  { %2642 = vmatpush1.bf16.msra.mxu0 %v3503_v39  ;;  %v2696_v39 = vld [vmem:[%s4962_s0 + $0x20] sm:$0xff] }
 0x818   :  { %2643 = vmatprep.subr.bf16.mxu0 %v3508_v26 }
 0x81b   :  { %2644 = vmatpush1.bf16.msra.mxu0 %v3506_v20 }
 0x81c   :  { %2645 = vmatprep.subr.bf16.mxu0 %v3511_v29 }
 0x81f   :  { %2646 = vmatpush1.bf16.msra.mxu0 %v3509_v40 }
 0x820   :  { %2647 = vmatprep.subr.bf16.mxu0 %v3514_v15  ;;  %v2697_v15 = vld [vmem:[%s4962_s0 + $0x28] sm:$0xff] }
 0x823   :  { %2648 = vmatpush2.bf16.msra.mxu0 %v3512_v10 }
 0x824   :  { %2649 = vmatprep.subr.bf16.mxu0 %v3517_v23 }
 0x827   :  { %2650 = vmatpush2.bf16.msra.mxu0 %v3515_v41 }
 0x828   :  { %2651 = vmatprep.subr.bf16.mxu0 %v3520_v27 }
 0x82b   :  { %2652 = vmatpush2.bf16.msra.mxu0 %v3518_v21 }
 0x82c   :  { %2653 = vmatprep.subr.bf16.mxu0 %v3523_v19  ;;  %v2698_v19 = vld [vmem:[%s4962_s0 + $0x30] sm:$0xff] }
 0x82f   :  { %2654 = vmatpush2.bf16.msra.mxu0 %v3521_v42 }
 0x830   :  { %2655 = vmatprep.subr.bf16.mxu0 %v3526_v1 }
 0x833   :  { %2656 = vmatpush2.bf16.msra.mxu0 %v3524_v22 }
 0x834   :  { %2657 = vmatprep.subr.bf16.mxu0 %v3529_v46 }
 0x837   :  { %2658 = vmatpush2.bf16.msra.mxu0 %v3527_v47  ;;  %v2699_v47 = vld [vmem:[%s4962_s0 + $0x38] sm:$0xff] }
 0x838   :  { %2659 = vmatprep.subr.bf16.mxu0 %v3532_v49 }
 0x83b   :  { %2660 = vmatpush2.bf16.msra.mxu0 %v3530_v50 }
 0x83c   :  { %2661 = vmatprep.subr.bf16.mxu0 %v3535_v53 }
 0x83f   :  { %2662 = vmatpush2.bf16.msra.mxu0 %v3533_v54 }
 0x842   :  { %2664 = vmatmul.mubr.bf16.vlgmr.msra.gmra.mxu0 %v4832_v28 }
 0x843   :  { %2673 = vmatprep.mubr.bf16.mxu0 %v2466_v60 }
 0x84a   :  { %2674 = vmatmul.mubr.bf16.gmra.mxu0 %v2464_v63 }
 0x8be   :  { %v2393_v7 = vpop.f32.mrf.mxu1 }
 0x8c0   :  { %v2395_v11 = vpop.f32.mrf.mxu1 }
 0x8c2   :  { %v2171_v5 = vpop.f32.mrf.mxu0  ;;  %v2397_v43 = vpop.f32.mrf.mxu1 }
 0x8c3   :  { %v2394_v45 = vadd.f32 %v2393_v7, %v2171_v5 }
 0x8c4   :  { %v2173_v0 = vpop.f32.mrf.mxu0  ;;  %v2399_v56 = vpop.f32.mrf.mxu1 }
 0x8c5   :  { %v2396_v12 = vadd.f32 %v2395_v11, %v2173_v0 }
 0x8c6   :  { %v2175_v2 = vpop.f32.mrf.mxu0  ;;  %v2403_v59 = vpop.f32.mrf.mxu1 }
 0x8c7   :  { %v2398_v28 = vadd.f32 %v2397_v43, %v2175_v2 }
 0x8c8   :  { %v2177_v3 = vpop.f32.mrf.mxu0  ;;  %v2405_v31 = vpop.f32.mrf.mxu1 }
 0x8c9   :  { %v2400_v33 = vadd.f32 %v2399_v56, %v2177_v3 }
 0x8ca   :  { %v2181_v8 = vpop.f32.mrf.mxu0  ;;  %v2407_v9 = vpop.f32.mrf.mxu1 }
 0x8cb   :  { %v2404_v58 = vadd.f32 %v2403_v59, %v2181_v8 }
 0x8cc   :  { %v2183_v44 = vpop.f32.mrf.mxu0  ;;  %v2409_v27 = vpop.f32.mrf.mxu1 }
 0x8cd   :  { %v2406_v26 = vadd.f32 %v2405_v31, %v2183_v44 }
 0x8ce   :  { %v2185_v13 = vpop.f32.mrf.mxu0 }
 0x8cf   :  { %v2408_v10 = vadd.f32 %v2407_v9, %v2185_v13 }
 0x8d0   :  { %v2187_v25 = vpop.f32.mrf.mxu0 }
 0x8d1   :  { %v2410_v42 = vadd.f32 %v2409_v27, %v2187_v25 }
 0x902   :  { %v2665_v14 = vpop.f32.mrf.mxu0 }
 0x903   :  { %v2684_v16 = vadd.f32 %v2665_v14, %v2394_v45 }
 0x904   :  { %v2667_v17 = vpop.f32.mrf.mxu0 }
 0x905   :  { %v2700_v4 = vadd.f32 %v2692_v51, %v2684_v16  ;;  %v2685_v30 = vadd.f32 %v2667_v17, %v2396_v12 }
 0x906   :  { %v2669_v32 = vpop.f32.mrf.mxu0 }
 0x907   :  { %2708 = vst [vmem:[#allocation4] sm:$0xff] %v2700_v4  ;;  %v2701_v34 = vadd.f32 %v2693_v18, %v2685_v30  ;;  %v2686_v35 = vadd.f32 %v2669_v32, %v2398_v28 }
 0x908   :  { %v2671_v36 = vpop.f32.mrf.mxu0 }
 0x909   :  { %2709 = vst [vmem:[#allocation4 + $0x8] sm:$0xff] %v2701_v34  ;;  %v2702_v38 = vadd.f32 %v2694_v48, %v2686_v35  ;;  %v2687_v24 = vadd.f32 %v2671_v36, %v2400_v33 }
 0x90a   :  { %v2675_v62 = vpop.f32.mrf.mxu0 }
 0x90b   :  { %2710 = vst [vmem:[#allocation4 + $0x10] sm:$0xff] %v2702_v38  ;;  %v2703_v20 = vadd.f32 %v2695_v37, %v2687_v24  ;;  %v2688_v29 = vadd.f32 %v2675_v62, %v2404_v58 }
 0x90c   :  { %v2677_v40 = vpop.f32.mrf.mxu0 }
 0x90d   :  { %2711 = vst [vmem:[#allocation4 + $0x18] sm:$0xff] %v2703_v20  ;;  %v2704_v23 = vadd.f32 %v2696_v39, %v2688_v29  ;;  %v2689_v41 = vadd.f32 %v2677_v40, %v2406_v26 }
 0x90e   :  { %v2679_v21 = vpop.f32.mrf.mxu0 }
 0x90f   :  { %2712 = vst [vmem:[#allocation4 + $0x20] sm:$0xff] %v2704_v23  ;;  %v2705_v1 = vadd.f32 %v2697_v15, %v2689_v41  ;;  %v2690_v22 = vadd.f32 %v2679_v21, %v2408_v10 }
 0x910   :  { %v2681_v46 = vpop.f32.mrf.mxu0 }
 0x911   :  { %2713 = vst [vmem:[#allocation4 + $0x28] sm:$0xff] %v2705_v1  ;;  %v2706_v49 = vadd.f32 %v2698_v19, %v2690_v22  ;;  %v2691_v50 = vadd.f32 %v2681_v46, %v2410_v42 }
 0x913   :  { %2714 = vst [vmem:[#allocation4 + $0x30] sm:$0xff] %v2706_v49  ;;  %v2707_v52 = vadd.f32 %v2699_v47, %v2691_v50 }
 0x915   :  { %2715 = vst [vmem:[#allocation4 + $0x38] sm:$0xff] %v2707_v52 }
 0x916   :  { %3553 = shalt.err (!%p3550_p4)
}
 0x917   :  { %s3568_s7 = smov 256   ;;  %s3569_s2 = smov 16  }
 0x918   :  { %2727 = dma.vmem_to_hbm [thread:$0]  %s2722_s26, 1024, %s4973_s11, [#allocation5], %s3568_s7, %s3568_s7, %s3569_s2  }
 0x919   :  { %3562 = dma.done.wait [#allocation5], 1024  }
 0x91a   :  { %3563 = vsyncadd [#allocation5], 4294966272 }
 0x91b   :  { %2731 = vsyncpa [#allocation5], 1 }

</bundles_post_ra>
